<compile_context>
chip_gen: v7x
topology: tpu7x:2x2x1
jax: 0.10.0
libtpu: 0.0.40
codegen_flags: <defaults>
</compile_context>

<pallas_src>
import math

import jax
import jax.numpy as jnp
from jax import lax
from jax.experimental import pallas as pl
from jax.experimental.pallas import tpu as pltpu

C = 64                                # self.C
N_FREQS = 4                           # PositionalEncoding(4)
N_GROUPS = 2 * N_FREQS + 1            # identity + sin/cos per frequency = 9
PE_DIM = 3 * N_GROUPS                 # 27
BF16 = jnp.bfloat16
F32 = jnp.float32

# TODO(synk): PositionalEncoding(4) is assumed to be [x, sin(2^k x), cos(2^k x)] for
# k = 0..3 (no pi scaling, identity included); the pure-JAX reference uses the same.


# -----------------------------------------------------------------------------
# Fused kernel
# -----------------------------------------------------------------------------
def _make_fused_kernel(D, CW, n_chunk, vq):
    n_hidden = 4

    def kernel(cond_ref, wi_ref,
               mw0, mb0, mw1, mb1, mw2, mb2, mw3, mb3,     # cond MLP (last layer cols permuted)
               ew0, eb0, ewh, ebh, f1m, f1b,               # features0 / features1 (packed)
               *outs):
        if vq:
            ct_out, pdf_out, vqt_out, vqpdf_out = outs
        else:
            ct_out, pdf_out = outs

        def bdot(x, w):
            # bf16 MXU operands, f32 accumulation.
            return jnp.dot(x.astype(BF16), w, preferred_element_type=F32)

        cond = cond_ref[...]
        tb = cond.shape[0]

        # ---- cond MLP: 10 -> 32 -> 32 -> 32 -> 4D, output columns [w | vx | vy | ct]
        h = jnp.maximum(bdot(cond, mw0[...]) + mb0[...], 0.0)
        h = jnp.maximum(bdot(h, mw1[...]) + mb1[...], 0.0)
        h = jnp.maximum(bdot(h, mw2[...]) + mb2[...], 0.0)
        feat = bdot(h, mw3[...]) + mb3[...]                 # (tb, 4D)

        w = jnp.maximum(feat[:, :D], 0.0)                   # lobe weights
        vx = feat[:, D:2 * D]
        vy = feat[:, 2 * D:3 * D]
        ct = 1.0 / (1.0 + jnp.exp(-feat[:, 3 * D:4 * D]))   # sigmoid (f32)

        # NF.normalize(v, dim=-1): rsqrt on the EUP instead of sqrt + divides.
        inv = lax.rsqrt(jnp.maximum(vx * vx + vy * vy, 1e-24))
        vxn = vx * inv
        vyn = vy * inv

        # wi_rot = einsum('bdij,bj->bdi', [[vx,-vy],[vy,vx]], wi)
        wix = wi_ref[:, 0:1]
        wiy = wi_ref[:, 1:2]
        rx = vxn * wix - vyn * wiy
        ry = vyn * wix + vxn * wiy

        ct_out[...] = ct

        # ---- theta stack (vq path shares one features0 pass via row stacking) -------
        if vq:
            vqt = jnp.clip(jnp.floor(ct * 100.0 + 0.5), 0.0, 99.0) / 100.0
            vqt_out[...] = vqt
            theta = jnp.concatenate([ct, vqt], axis=0)      # (2tb, D)
            rx2 = jnp.concatenate([rx, rx], axis=0)
            ry2 = jnp.concatenate([ry, ry], axis=0)
        else:
            theta, rx2, ry2 = ct, rx, ry

        # ---- positional encoding: X=[rx|ry|theta], enc=[X, sin X, cos X, sin 2X, ...]
        X = jnp.concatenate([rx2, ry2, theta], axis=-1)     # (n, 3D)
        groups = [X]
        for k in range(N_FREQS):
            f = float(2 ** k)
            groups.append(jnp.sin(f * X))
            groups.append(jnp.cos(f * X))
        enc = jnp.concatenate(groups, axis=-1)               # (n, 27*D)

        # ---- features0 layer 0: dense (27*D, D*C) block-expanded weight -------------
        h0 = jnp.maximum(bdot(enc, ew0[...]) + eb0[...], 0.0)    # (n, D*C)

        # ---- hidden layers: 256-lane chunks, SHARED block-diag (CW, CW) weight ------
        chunks = [h0[:, j * CW:(j + 1) * CW] for j in range(n_chunk)]
        for k in range(n_hidden):
            wk = ewh[k]                                      # (CW, CW) bf16
            bk = ebh[k]                                      # (1, CW)  f32
            chunks = [jnp.maximum(bdot(cj, wk) + bk, 0.0) for cj in chunks]

        # ---- features1: einsum('bdc,dc->bd') folded into per-chunk (CW, D) matmuls --
        lob = f1b[...]
        for j in range(n_chunk):
            lob = lob + bdot(chunks[j], f1m[j])              # (n, D)

        # softplus (stable)
        lobes = jnp.maximum(lob, 0.0) + jnp.log(1.0 + jnp.exp(-jnp.abs(lob)))

        if vq:
            pdf_out[...] = jnp.sum(lobes[:tb] * w, axis=-1, keepdims=True)
            vqpdf_out[...] = jnp.sum(lobes[tb:] * w, axis=-1, keepdims=True)
        else:
            pdf_out[...] = jnp.sum(lobes * w, axis=-1, keepdims=True)

    return kernel


# -----------------------------------------------------------------------------
# One-time parameter packing: torch layout -> kernel layout (hoisted out of forward)
# -----------------------------------------------------------------------------
def pack_params(params):
    D = params['D']
    chunk_d = 4 if D % 4 == 0 else D          # lobes per 256-lane chunk
    n_chunk = D // chunk_d
    CW = chunk_d * C
    eyeD = jnp.eye(D, dtype=F32)

    # cond MLP: permute last-layer output columns [w | (vx,vy interleaved) | ct] ->
    # [w | vx | vy | ct]; weights cast to bf16, biases kept f32.
    perm = jnp.array(list(range(D))
                     + [D + 2 * d for d in range(D)]
                     + [D + 2 * d + 1 for d in range(D)]
                     + list(range(3 * D, 4 * D)), jnp.int32)
    mlp_flat = []
    for (w, b) in params['mlp'][:-1]:
        mlp_flat += [w.astype(BF16), b.reshape(1, -1).astype(F32)]
    wl, bl = params['mlp'][-1]
    mlp_flat += [wl[:, perm].astype(BF16), bl[perm].reshape(1, -1).astype(F32)]

    f0 = params['features0']

    # layer 0: enc layout is [X | sinX | cosX | sin2X | ...] with X = [rx|ry|theta],
    # lane index = 24g + 8s + d  ->  ew0[24g+8s+d, 64d'+c] = w0[3g+s, c] * delta(d, d').
    w0, b0 = f0[0]                                           # (27, C), (C,)
    w0_r = w0.reshape(N_GROUPS, 3, C)
    ew0 = jnp.einsum('gsc,de->gsdec', w0_r, eyeD).reshape(N_GROUPS * 3 * D, D * C).astype(BF16)
    eb0 = jnp.tile(b0, D).reshape(1, D * C).astype(F32)

    # hidden layers 1..4: shared block-diag (CW, CW) weight (per-d MLP weights are
    # identical), stacked into one (4, CW, CW) array; biases into (4, 1, CW).
    eyeC = jnp.eye(chunk_d, dtype=F32)
    ew_h, eb_h = [], []
    for (w, b) in f0[1:]:
        ew_h.append(jnp.einsum('ab,ij->iajb', w, eyeC).reshape(CW, CW))
        eb_h.append(jnp.tile(b, chunk_d).reshape(1, CW))
    ewh = jnp.stack(ew_h, 0).astype(BF16)                    # (4, CW, CW)
    ebh = jnp.stack(eb_h, 0).astype(F32)                     # (4, 1, CW)

    # features1: einsum('bdc,dc->bd') as per-chunk (CW, D) matmul pieces.
    f1_w_r = params['f1_w'].reshape(n_chunk, chunk_d, C)     # (j, ld, c)
    sel = eyeD.reshape(n_chunk, chunk_d, D)                  # delta(d, j*chunk_d + ld)
    f1m = jnp.einsum('jlc,jld->jlcd', f1_w_r, sel).reshape(n_chunk, CW, D).astype(BF16)
    f1b = params['f1_b'].reshape(1, D).astype(F32)

    arrays = tuple(mlp_flat) + (ew0, eb0, ewh, ebh, f1m, f1b)
    return {'arrays': arrays, 'D': D, 'chunk_d': chunk_d, 'n_chunk': n_chunk, 'CW': CW}


# -----------------------------------------------------------------------------
# Tile-size selection: prefer >= 2 grid steps (v7x megacore), rows multiple of 8.
# -----------------------------------------------------------------------------
def _pick_tb(B, tb_max=512):
    if B <= 8:
        return B
    tb = min(tb_max, B)
    tb -= tb % 8
    while tb > 8 and B % tb != 0:
        tb -= 8
    if tb < 8 or B % tb != 0:
        return B
    if B // tb == 1 and (B // 2) % 8 == 0:
        tb = B // 2
    return tb


# -----------------------------------------------------------------------------
# Forward
# -----------------------------------------------------------------------------
def base2d_forward(packed, wi, cond, vq=False, *, tb=None):
    B, cond_dim = cond.shape
    D, CW, n_chunk = packed['D'], packed['CW'], packed['n_chunk']
    arrays = packed['arrays']

    if tb is None:
        tb = _pick_tb(B)
    assert B % tb == 0, "batch must be divisible by the tile size"
    grid = (B // tb,)

    out_shapes = [jax.ShapeDtypeStruct((B, D), F32),
                  jax.ShapeDtypeStruct((B, 1), F32)]
    out_specs = [pl.BlockSpec((tb, D), lambda i: (i, 0)),
                 pl.BlockSpec((tb, 1), lambda i: (i, 0))]
    if vq:
        out_shapes += [jax.ShapeDtypeStruct((B, D), F32),
                       jax.ShapeDtypeStruct((B, 1), F32)]
        out_specs += [pl.BlockSpec((tb, D), lambda i: (i, 0)),
                      pl.BlockSpec((tb, 1), lambda i: (i, 0))]

    in_specs = ([pl.BlockSpec((tb, cond_dim), lambda i: (i, 0)),
                 pl.BlockSpec((tb, 2), lambda i: (i, 0))]
                + [pl.BlockSpec(a.shape, lambda i, nd=a.ndim: (0,) * nd)
                   for a in arrays])

    outs = pl.pallas_call(
        _make_fused_kernel(D, CW, n_chunk, vq),
        out_shape=tuple(out_shapes),
        grid_spec=pltpu.PrefetchScalarGridSpec(
            num_scalar_prefetch=0,
            grid=grid,
            in_specs=in_specs,
            out_specs=out_specs,
        ),
        compiler_params=pltpu.CompilerParams(
            dimension_semantics=("parallel",),
            vmem_limit_bytes=48 * 1024 * 1024,
        ),
    )(cond, wi, *arrays)

    if vq:
        ct, pdf, vqt, vqpdf = outs
        return {'cos_theta': ct, 'vq_theta': vqt,
                'pdf': pdf.reshape(B), 'vq_pdf': vqpdf.reshape(B)}
    ct, pdf = outs
    return {'cos_theta': ct, 'pdf': pdf.reshape(B)}


# -----------------------------------------------------------------------------
# Deterministic parameter init (nn.Linear-style uniform(-1/sqrt(fan_in), ...))
# -----------------------------------------------------------------------------
def init_linear(key, fan_in, fan_out):
    kw, kb = jax.random.split(key)
    bound = 1.0 / math.sqrt(fan_in)
    w = jax.random.uniform(kw, (fan_in, fan_out), F32, -bound, bound)
    b = jax.random.uniform(kb, (fan_out,), F32, -bound, bound)
    return w, b


def init_params(key, D):
    keys = jax.random.split(key, 10)
    ki = iter(keys)
    dims = [8 + 2, 32, 32, 32, 4 * D]                       # self.mlp
    mlp_p = [init_linear(next(ki), dims[i], dims[i + 1]) for i in range(4)]
    fdims = [PE_DIM] + [C] * 5                              # self.features0
    f0_p = [init_linear(next(ki), fdims[i], fdims[i + 1]) for i in range(5)]
    f1_wT, f1_b = init_linear(next(ki), C, D)               # self.features1
    return {'D': D, 'mlp': mlp_p, 'features0': f0_p,
            'f1_w': f1_wT.T, 'f1_b': f1_b}                  # f1_w in torch (D, C) layout


# -----------------------------------------------------------------------------
# Pure-JAX reference (mirrors the torch forward, f32, torch param layout)
# -----------------------------------------------------------------------------
def _posenc(x):
    parts = [x]
    for k in range(N_FREQS):
        f = float(2 ** k)
        parts.append(jnp.sin(f * x))
        parts.append(jnp.cos(f * x))
    return jnp.concatenate(parts, axis=-1)


def _reference_cond(params, wi, cond):
    B = cond.shape[0]
    D = params['D']
    h = cond
    for (w, b) in params['mlp'][:-1]:
        h = jnp.maximum(h @ w + b, 0.0)
    wl, bl = params['mlp'][-1]
    feat = h @ wl + bl
    weight = jnp.maximum(feat[..., :D], 0.0)
    v = feat[..., D:3 * D].reshape(B, D, 2)
    ct = 1.0 / (1.0 + jnp.exp(-feat[..., 3 * D:]))
    v = v / jnp.maximum(jnp.sqrt((v * v).sum(-1, keepdims=True)), 1e-12)
    R = jnp.stack([v[..., 0], -v[..., 1], v[..., 1], v[..., 0]], -1).reshape(B, D, 2, 2)
    wir = jnp.einsum('bdij,bj->bdi', R, wi)
    return weight, wir, ct


def _reference_lobe_pdf(params, wir, theta, weight):
    B, D = theta.shape
    x = jnp.concatenate([wir, theta[..., None]], -1).reshape(B * D, 3)
    h = _posenc(x)
    for (w, b) in params['features0'][:-1]:
        h = jnp.maximum(h @ w + b, 0.0)
    w4, b4 = params['features0'][-1]
    inter = jnp.maximum(h @ w4 + b4, 0.0).reshape(B, D, C)
    lobes = jnp.einsum('bdc,dc->bd', inter, params['f1_w']) + params['f1_b']
    lobes = jnp.maximum(lobes, 0.0) + jnp.log(1.0 + jnp.exp(-jnp.abs(lobes)))
    return (lobes * weight).sum(-1)


def reference_forward(params, wi, cond):
    weight, wir, ct = _reference_cond(params, wi, cond)
    pdf = _reference_lobe_pdf(params, wir, ct, weight)
    return {'cos_theta': ct, 'pdf': pdf}


if __name__ == "__main__":
    D = 8
    key = jax.random.PRNGKey(0)
    kp, kw, kc = jax.random.split(key, 3)
    params = init_params(kp, D)
    packed = pack_params(params)          # packed ONCE, reused across forward calls

    def make_inputs(B, k1, k2):
        ang = jax.random.uniform(k1, (B,), F32, 0.0, 2.0 * math.pi)
        wi = jnp.stack([jnp.cos(ang), jnp.sin(ang)], axis=-1)   # (B, 2) unit directions
        cond = jax.random.normal(k2, (B, 8 + 2), F32)           # (B, 10)
        return wi, cond

    # Small primary test (auto tile -> 2 grid steps).
    B = 16
    wi, cond = make_inputs(B, kw, kc)
    out = base2d_forward(packed, wi, cond, vq=False)
    jax.block_until_ready(out)
    ref = reference_forward(params, wi, cond)
    assert out['cos_theta'].shape == (B, D)
    assert out['pdf'].shape == (B,)
    assert jnp.allclose(out['cos_theta'], ref['cos_theta'], rtol=2e-2, atol=5e-3)
    assert jnp.allclose(out['pdf'], ref['pdf'], rtol=5e-2, atol=1e-2)

    # Multi-tile check (explicit tb, grid of 2 steps) to validate the tiled index maps.
    B2 = 64
    kw2, kc2 = jax.random.split(jax.random.PRNGKey(1))
    wi2, cond2 = make_inputs(B2, kw2, kc2)
    out2 = base2d_forward(packed, wi2, cond2, vq=False, tb=32)
    jax.block_until_ready(out2)
    ref2 = reference_forward(params, wi2, cond2)
    assert jnp.allclose(out2['cos_theta'], ref2['cos_theta'], rtol=2e-2, atol=5e-3)
    assert jnp.allclose(out2['pdf'], ref2['pdf'], rtol=5e-2, atol=1e-2)

    # vq path (row-stacked ct / vq_theta encodings share one features0 pass).
    outv = base2d_forward(packed, wi, cond, vq=True)
    jax.block_until_ready(outv)
    vqt_expected = jnp.clip(jnp.floor(outv['cos_theta'] * 100.0 + 0.5), 0.0, 99.0) / 100.0
    assert jnp.allclose(outv['vq_theta'], vqt_expected, atol=1.01e-2)
    weight_r, wir_r, _ = _reference_cond(params, wi, cond)
    ref_vq_pdf = _reference_lobe_pdf(params, wir_r, outv['vq_theta'], weight_r)
    assert jnp.allclose(outv['vq_pdf'], ref_vq_pdf, rtol=5e-2, atol=1e-2)
    assert jnp.allclose(outv['pdf'], ref['pdf'], rtol=5e-2, atol=1e-2)

    print("KERNEL_OK")
</pallas_src>

<mosaic_0001>
module attributes {stable_mosaic.version = 11 : i64} {
  func.func @kernel(%arg0: i32, %arg1: memref<8x10xf32, #tpu.memory_space<vmem>>, %arg2: memref<8x2xf32, #tpu.memory_space<vmem>>, %arg3: memref<10x32xbf16, #tpu.memory_space<vmem>>, %arg4: memref<1x32xf32, #tpu.memory_space<vmem>>, %arg5: memref<32x32xbf16, #tpu.memory_space<vmem>>, %arg6: memref<1x32xf32, #tpu.memory_space<vmem>>, %arg7: memref<32x32xbf16, #tpu.memory_space<vmem>>, %arg8: memref<1x32xf32, #tpu.memory_space<vmem>>, %arg9: memref<32x32xbf16, #tpu.memory_space<vmem>>, %arg10: memref<1x32xf32, #tpu.memory_space<vmem>>, %arg11: memref<216x512xbf16, #tpu.memory_space<vmem>>, %arg12: memref<1x512xf32, #tpu.memory_space<vmem>>, %arg13: memref<4x256x256xbf16, #tpu.memory_space<vmem>>, %arg14: memref<4x1x256xf32, #tpu.memory_space<vmem>>, %arg15: memref<2x256x8xbf16, #tpu.memory_space<vmem>>, %arg16: memref<1x8xf32, #tpu.memory_space<vmem>>, %arg17: memref<8x8xf32, #tpu.memory_space<vmem>>, %arg18: memref<8x1xf32, #tpu.memory_space<vmem>>) attributes {dimension_semantics = [#tpu.dimension_semantics<parallel>], iteration_bounds = array<i64: 2>, scalar_prefetch = 0 : i64, scratch_operands = 0 : i64, tpu.core_type = #tpu.core_type<tc>, window_params = [{transform_indices = @transform_0, window_bounds = array<i64: 8, 10>}, {transform_indices = @transform_1, window_bounds = array<i64: 8, 2>}, {pipeline_mode = #tpu.pipeline_mode<synchronous>, transform_indices = @transform_2, window_bounds = array<i64: 10, 32>}, {pipeline_mode = #tpu.pipeline_mode<synchronous>, transform_indices = @transform_3, window_bounds = array<i64: 1, 32>}, {pipeline_mode = #tpu.pipeline_mode<synchronous>, transform_indices = @transform_4, window_bounds = array<i64: 32, 32>}, {pipeline_mode = #tpu.pipeline_mode<synchronous>, transform_indices = @transform_5, window_bounds = array<i64: 1, 32>}, {pipeline_mode = #tpu.pipeline_mode<synchronous>, transform_indices = @transform_6, window_bounds = array<i64: 32, 32>}, {pipeline_mode = #tpu.pipeline_mode<synchronous>, transform_indices = @transform_7, window_bounds = array<i64: 1, 32>}, {pipeline_mode = #tpu.pipeline_mode<synchronous>, transform_indices = @transform_8, window_bounds = array<i64: 32, 32>}, {pipeline_mode = #tpu.pipeline_mode<synchronous>, transform_indices = @transform_9, window_bounds = array<i64: 1, 32>}, {pipeline_mode = #tpu.pipeline_mode<synchronous>, transform_indices = @transform_10, window_bounds = array<i64: 216, 512>}, {pipeline_mode = #tpu.pipeline_mode<synchronous>, transform_indices = @transform_11, window_bounds = array<i64: 1, 512>}, {pipeline_mode = #tpu.pipeline_mode<synchronous>, transform_indices = @transform_12, window_bounds = array<i64: 4, 256, 256>}, {pipeline_mode = #tpu.pipeline_mode<synchronous>, transform_indices = @transform_13, window_bounds = array<i64: 4, 1, 256>}, {pipeline_mode = #tpu.pipeline_mode<synchronous>, transform_indices = @transform_14, window_bounds = array<i64: 2, 256, 8>}, {pipeline_mode = #tpu.pipeline_mode<synchronous>, transform_indices = @transform_15, window_bounds = array<i64: 1, 8>}, {transform_indices = @transform_16, window_bounds = array<i64: 8, 8>}, {transform_indices = @transform_17, window_bounds = array<i64: 8, 1>}]} {
    %c0 = arith.constant 0 : index
    %c0_0 = arith.constant 0 : index
    %0 = vector.load %arg1[%c0, %c0_0] : memref<8x10xf32, #tpu.memory_space<vmem>>, vector<8x10xf32>
    %c0_1 = arith.constant 0 : index
    %c0_2 = arith.constant 0 : index
    %1 = vector.load %arg3[%c0_1, %c0_2] : memref<10x32xbf16, #tpu.memory_space<vmem>>, vector<10x32xbf16>
    %2 = arith.truncf %0 : vector<8x10xf32> to vector<8x10xbf16>
    %cst = arith.constant dense<0.000000e+00> : vector<8x32xf32>
    %3 = tpu.matmul %2, %1, %cst {dimension_numbers = #tpu.dot_dimension_numbers<[1], [0], [0], [1], [0, 0, 1, 1], [], []>} : vector<8x10xbf16>, vector<10x32xbf16>, vector<8x32xf32> -> vector<8x32xf32>
    %c0_3 = arith.constant 0 : index
    %c0_4 = arith.constant 0 : index
    %4 = vector.load %arg4[%c0_3, %c0_4] : memref<1x32xf32, #tpu.memory_space<vmem>>, vector<1x32xf32>
    %5 = vector.broadcast %4 : vector<1x32xf32> to vector<8x32xf32>
    %6 = arith.addf %3, %5 : vector<8x32xf32>
    %cst_5 = arith.constant 0.000000e+00 : f32
    %7 = vector.broadcast %cst_5 : f32 to vector<8x32xf32>
    %8 = arith.maximumf %6, %7 : vector<8x32xf32>
    %c0_6 = arith.constant 0 : index
    %c0_7 = arith.constant 0 : index
    %9 = vector.load %arg5[%c0_6, %c0_7] : memref<32x32xbf16, #tpu.memory_space<vmem>>, vector<32x32xbf16>
    %10 = arith.truncf %8 : vector<8x32xf32> to vector<8x32xbf16>
    %cst_8 = arith.constant dense<0.000000e+00> : vector<8x32xf32>
    %11 = tpu.matmul %10, %9, %cst_8 {dimension_numbers = #tpu.dot_dimension_numbers<[1], [0], [0], [1], [0, 0, 1, 1], [], []>} : vector<8x32xbf16>, vector<32x32xbf16>, vector<8x32xf32> -> vector<8x32xf32>
    %c0_9 = arith.constant 0 : index
    %c0_10 = arith.constant 0 : index
    %12 = vector.load %arg6[%c0_9, %c0_10] : memref<1x32xf32, #tpu.memory_space<vmem>>, vector<1x32xf32>
    %13 = vector.broadcast %12 : vector<1x32xf32> to vector<8x32xf32>
    %14 = arith.addf %11, %13 : vector<8x32xf32>
    %cst_11 = arith.constant 0.000000e+00 : f32
    %15 = vector.broadcast %cst_11 : f32 to vector<8x32xf32>
    %16 = arith.maximumf %14, %15 : vector<8x32xf32>
    %c0_12 = arith.constant 0 : index
    %c0_13 = arith.constant 0 : index
    %17 = vector.load %arg7[%c0_12, %c0_13] : memref<32x32xbf16, #tpu.memory_space<vmem>>, vector<32x32xbf16>
    %18 = arith.truncf %16 : vector<8x32xf32> to vector<8x32xbf16>
    %cst_14 = arith.constant dense<0.000000e+00> : vector<8x32xf32>
    %19 = tpu.matmul %18, %17, %cst_14 {dimension_numbers = #tpu.dot_dimension_numbers<[1], [0], [0], [1], [0, 0, 1, 1], [], []>} : vector<8x32xbf16>, vector<32x32xbf16>, vector<8x32xf32> -> vector<8x32xf32>
    %c0_15 = arith.constant 0 : index
    %c0_16 = arith.constant 0 : index
    %20 = vector.load %arg8[%c0_15, %c0_16] : memref<1x32xf32, #tpu.memory_space<vmem>>, vector<1x32xf32>
    %21 = vector.broadcast %20 : vector<1x32xf32> to vector<8x32xf32>
    %22 = arith.addf %19, %21 : vector<8x32xf32>
    %cst_17 = arith.constant 0.000000e+00 : f32
    %23 = vector.broadcast %cst_17 : f32 to vector<8x32xf32>
    %24 = arith.maximumf %22, %23 : vector<8x32xf32>
    %c0_18 = arith.constant 0 : index
    %c0_19 = arith.constant 0 : index
    %25 = vector.load %arg9[%c0_18, %c0_19] : memref<32x32xbf16, #tpu.memory_space<vmem>>, vector<32x32xbf16>
    %26 = arith.truncf %24 : vector<8x32xf32> to vector<8x32xbf16>
    %cst_20 = arith.constant dense<0.000000e+00> : vector<8x32xf32>
    %27 = tpu.matmul %26, %25, %cst_20 {dimension_numbers = #tpu.dot_dimension_numbers<[1], [0], [0], [1], [0, 0, 1, 1], [], []>} : vector<8x32xbf16>, vector<32x32xbf16>, vector<8x32xf32> -> vector<8x32xf32>
    %c0_21 = arith.constant 0 : index
    %c0_22 = arith.constant 0 : index
    %28 = vector.load %arg10[%c0_21, %c0_22] : memref<1x32xf32, #tpu.memory_space<vmem>>, vector<1x32xf32>
    %29 = vector.broadcast %28 : vector<1x32xf32> to vector<8x32xf32>
    %30 = arith.addf %27, %29 : vector<8x32xf32>
    %31 = vector.extract_strided_slice %30 {offsets = [0, 0], sizes = [8, 8], strides = [1, 1]} : vector<8x32xf32> to vector<8x8xf32>
    %cst_23 = arith.constant 0.000000e+00 : f32
    %32 = vector.broadcast %cst_23 : f32 to vector<8x8xf32>
    %33 = arith.maximumf %31, %32 : vector<8x8xf32>
    %34 = vector.extract_strided_slice %30 {offsets = [0, 8], sizes = [8, 8], strides = [1, 1]} : vector<8x32xf32> to vector<8x8xf32>
    %35 = vector.extract_strided_slice %30 {offsets = [0, 16], sizes = [8, 8], strides = [1, 1]} : vector<8x32xf32> to vector<8x8xf32>
    %36 = vector.extract_strided_slice %30 {offsets = [0, 24], sizes = [8, 8], strides = [1, 1]} : vector<8x32xf32> to vector<8x8xf32>
    %cst_24 = arith.constant 0.000000e+00 : f32
    %37 = vector.broadcast %cst_24 : f32 to vector<8x8xf32>
    %38 = arith.subf %37, %36 : vector<8x8xf32>
    %39 = math.exp %38 : vector<8x8xf32>
    %cst_25 = arith.constant 1.000000e+00 : f32
    %40 = vector.broadcast %cst_25 : f32 to vector<8x8xf32>
    %41 = arith.addf %40, %39 : vector<8x8xf32>
    %cst_26 = arith.constant 1.000000e+00 : f32
    %42 = vector.broadcast %cst_26 : f32 to vector<8x8xf32>
    %43 = arith.divf %42, %41 : vector<8x8xf32>
    %44 = arith.mulf %34, %34 : vector<8x8xf32>
    %45 = arith.mulf %35, %35 : vector<8x8xf32>
    %46 = arith.addf %44, %45 : vector<8x8xf32>
    %cst_27 = arith.constant 1.000000e-24 : f32
    %47 = vector.broadcast %cst_27 : f32 to vector<8x8xf32>
    %48 = arith.maximumf %46, %47 : vector<8x8xf32>
    %49 = math.rsqrt %48 : vector<8x8xf32>
    %50 = arith.mulf %34, %49 : vector<8x8xf32>
    %51 = arith.mulf %35, %49 : vector<8x8xf32>
    %c0_28 = arith.constant 0 : index
    %c0_29 = arith.constant 0 : index
    %52 = vector.load %arg2[%c0_28, %c0_29] : memref<8x2xf32, #tpu.memory_space<vmem>>, vector<8x1xf32>
    %c0_30 = arith.constant 0 : index
    %c1 = arith.constant 1 : index
    %53 = vector.load %arg2[%c0_30, %c1] : memref<8x2xf32, #tpu.memory_space<vmem>>, vector<8x1xf32>
    %54 = vector.broadcast %52 : vector<8x1xf32> to vector<8x8xf32>
    %55 = arith.mulf %50, %54 : vector<8x8xf32>
    %56 = vector.broadcast %53 : vector<8x1xf32> to vector<8x8xf32>
    %57 = arith.mulf %51, %56 : vector<8x8xf32>
    %58 = arith.subf %55, %57 : vector<8x8xf32>
    %59 = vector.broadcast %52 : vector<8x1xf32> to vector<8x8xf32>
    %60 = arith.mulf %51, %59 : vector<8x8xf32>
    %61 = vector.broadcast %53 : vector<8x1xf32> to vector<8x8xf32>
    %62 = arith.mulf %50, %61 : vector<8x8xf32>
    %63 = arith.addf %60, %62 : vector<8x8xf32>
    %c0_31 = arith.constant 0 : index
    %c0_32 = arith.constant 0 : index
    %64 = vector.load %arg17[%c0_31, %c0_32] : memref<8x8xf32, #tpu.memory_space<vmem>>, vector<8x8xf32>
    tpu.vector_store %arg17[%c0_31, %c0_32], %43 {strides = array<i32>} : memref<8x8xf32, #tpu.memory_space<vmem>>, vector<8x8xf32>,
    %65 = tpu.concatenate %58, %63, %43 in 1 : vector<8x8xf32>, vector<8x8xf32>, vector<8x8xf32> -> vector<8x24xf32>
    %cst_33 = arith.constant 1.000000e+00 : f32
    %66 = vector.broadcast %cst_33 : f32 to vector<8x24xf32>
    %67 = arith.mulf %66, %65 : vector<8x24xf32>
    %68 = math.sin %67 : vector<8x24xf32>
    %cst_34 = arith.constant 1.000000e+00 : f32
    %69 = vector.broadcast %cst_34 : f32 to vector<8x24xf32>
    %70 = arith.mulf %69, %65 : vector<8x24xf32>
    %71 = math.cos %70 : vector<8x24xf32>
    %cst_35 = arith.constant 2.000000e+00 : f32
    %72 = vector.broadcast %cst_35 : f32 to vector<8x24xf32>
    %73 = arith.mulf %72, %65 : vector<8x24xf32>
    %74 = math.sin %73 : vector<8x24xf32>
    %cst_36 = arith.constant 2.000000e+00 : f32
    %75 = vector.broadcast %cst_36 : f32 to vector<8x24xf32>
    %76 = arith.mulf %75, %65 : vector<8x24xf32>
    %77 = math.cos %76 : vector<8x24xf32>
    %cst_37 = arith.constant 4.000000e+00 : f32
    %78 = vector.broadcast %cst_37 : f32 to vector<8x24xf32>
    %79 = arith.mulf %78, %65 : vector<8x24xf32>
    %80 = math.sin %79 : vector<8x24xf32>
    %cst_38 = arith.constant 4.000000e+00 : f32
    %81 = vector.broadcast %cst_38 : f32 to vector<8x24xf32>
    %82 = arith.mulf %81, %65 : vector<8x24xf32>
    %83 = math.cos %82 : vector<8x24xf32>
    %cst_39 = arith.constant 8.000000e+00 : f32
    %84 = vector.broadcast %cst_39 : f32 to vector<8x24xf32>
    %85 = arith.mulf %84, %65 : vector<8x24xf32>
    %86 = math.sin %85 : vector<8x24xf32>
    %cst_40 = arith.constant 8.000000e+00 : f32
    %87 = vector.broadcast %cst_40 : f32 to vector<8x24xf32>
    %88 = arith.mulf %87, %65 : vector<8x24xf32>
    %89 = math.cos %88 : vector<8x24xf32>
    %90 = tpu.concatenate %65, %68, %71, %74, %77, %80, %83, %86, %89 in 1 : vector<8x24xf32>, vector<8x24xf32>, vector<8x24xf32>, vector<8x24xf32>, vector<8x24xf32>, vector<8x24xf32>, vector<8x24xf32>, vector<8x24xf32>, vector<8x24xf32> -> vector<8x216xf32>
    %c0_41 = arith.constant 0 : index
    %c0_42 = arith.constant 0 : index
    %91 = vector.load %arg11[%c0_41, %c0_42] : memref<216x512xbf16, #tpu.memory_space<vmem>>, vector<216x512xbf16>
    %92 = arith.truncf %90 : vector<8x216xf32> to vector<8x216xbf16>
    %cst_43 = arith.constant dense<0.000000e+00> : vector<8x512xf32>
    %93 = tpu.matmul %92, %91, %cst_43 {dimension_numbers = #tpu.dot_dimension_numbers<[1], [0], [0], [1], [0, 0, 1, 1], [], []>} : vector<8x216xbf16>, vector<216x512xbf16>, vector<8x512xf32> -> vector<8x512xf32>
    %c0_44 = arith.constant 0 : index
    %c0_45 = arith.constant 0 : index
    %94 = vector.load %arg12[%c0_44, %c0_45] : memref<1x512xf32, #tpu.memory_space<vmem>>, vector<1x512xf32>
    %95 = vector.broadcast %94 : vector<1x512xf32> to vector<8x512xf32>
    %96 = arith.addf %93, %95 : vector<8x512xf32>
    %cst_46 = arith.constant 0.000000e+00 : f32
    %97 = vector.broadcast %cst_46 : f32 to vector<8x512xf32>
    %98 = arith.maximumf %96, %97 : vector<8x512xf32>
    %99 = vector.extract_strided_slice %98 {offsets = [0, 0], sizes = [8, 256], strides = [1, 1]} : vector<8x512xf32> to vector<8x256xf32>
    %100 = vector.extract_strided_slice %98 {offsets = [0, 256], sizes = [8, 256], strides = [1, 1]} : vector<8x512xf32> to vector<8x256xf32>
    %c0_47 = arith.constant 0 : index
    %c0_48 = arith.constant 0 : index
    %c0_49 = arith.constant 0 : index
    %101 = vector.load %arg13[%c0_47, %c0_48, %c0_49] : memref<4x256x256xbf16, #tpu.memory_space<vmem>>, vector<1x256x256xbf16>
    %102 = vector.shape_cast %101 : vector<1x256x256xbf16> to vector<256x256xbf16>
    %c0_50 = arith.constant 0 : index
    %c0_51 = arith.constant 0 : index
    %c0_52 = arith.constant 0 : index
    %103 = vector.load %arg14[%c0_50, %c0_51, %c0_52] : memref<4x1x256xf32, #tpu.memory_space<vmem>>, vector<1x1x256xf32>
    %104 = vector.shape_cast %103 : vector<1x1x256xf32> to vector<1x256xf32>
    %105 = arith.truncf %99 : vector<8x256xf32> to vector<8x256xbf16>
    %cst_53 = arith.constant dense<0.000000e+00> : vector<8x256xf32>
    %106 = tpu.matmul %105, %102, %cst_53 {dimension_numbers = #tpu.dot_dimension_numbers<[1], [0], [0], [1], [0, 0, 1, 1], [], []>} : vector<8x256xbf16>, vector<256x256xbf16>, vector<8x256xf32> -> vector<8x256xf32>
    %107 = vector.broadcast %104 : vector<1x256xf32> to vector<8x256xf32>
    %108 = arith.addf %106, %107 : vector<8x256xf32>
    %cst_54 = arith.constant 0.000000e+00 : f32
    %109 = vector.broadcast %cst_54 : f32 to vector<8x256xf32>
    %110 = arith.maximumf %108, %109 : vector<8x256xf32>
    %111 = arith.truncf %100 : vector<8x256xf32> to vector<8x256xbf16>
    %cst_55 = arith.constant dense<0.000000e+00> : vector<8x256xf32>
    %112 = tpu.matmul %111, %102, %cst_55 {dimension_numbers = #tpu.dot_dimension_numbers<[1], [0], [0], [1], [0, 0, 1, 1], [], []>} : vector<8x256xbf16>, vector<256x256xbf16>, vector<8x256xf32> -> vector<8x256xf32>
    %113 = vector.broadcast %104 : vector<1x256xf32> to vector<8x256xf32>
    %114 = arith.addf %112, %113 : vector<8x256xf32>
    %cst_56 = arith.constant 0.000000e+00 : f32
    %115 = vector.broadcast %cst_56 : f32 to vector<8x256xf32>
    %116 = arith.maximumf %114, %115 : vector<8x256xf32>
    %c1_57 = arith.constant 1 : index
    %c0_58 = arith.constant 0 : index
    %c0_59 = arith.constant 0 : index
    %117 = vector.load %arg13[%c1_57, %c0_58, %c0_59] : memref<4x256x256xbf16, #tpu.memory_space<vmem>>, vector<1x256x256xbf16>
    %118 = vector.shape_cast %117 : vector<1x256x256xbf16> to vector<256x256xbf16>
    %c1_60 = arith.constant 1 : index
    %c0_61 = arith.constant 0 : index
    %c0_62 = arith.constant 0 : index
    %119 = vector.load %arg14[%c1_60, %c0_61, %c0_62] : memref<4x1x256xf32, #tpu.memory_space<vmem>>, vector<1x1x256xf32>
    %120 = vector.shape_cast %119 : vector<1x1x256xf32> to vector<1x256xf32>
    %121 = arith.truncf %110 : vector<8x256xf32> to vector<8x256xbf16>
    %cst_63 = arith.constant dense<0.000000e+00> : vector<8x256xf32>
    %122 = tpu.matmul %121, %118, %cst_63 {dimension_numbers = #tpu.dot_dimension_numbers<[1], [0], [0], [1], [0, 0, 1, 1], [], []>} : vector<8x256xbf16>, vector<256x256xbf16>, vector<8x256xf32> -> vector<8x256xf32>
    %123 = vector.broadcast %120 : vector<1x256xf32> to vector<8x256xf32>
    %124 = arith.addf %122, %123 : vector<8x256xf32>
    %cst_64 = arith.constant 0.000000e+00 : f32
    %125 = vector.broadcast %cst_64 : f32 to vector<8x256xf32>
    %126 = arith.maximumf %124, %125 : vector<8x256xf32>
    %127 = arith.truncf %116 : vector<8x256xf32> to vector<8x256xbf16>
    %cst_65 = arith.constant dense<0.000000e+00> : vector<8x256xf32>
    %128 = tpu.matmul %127, %118, %cst_65 {dimension_numbers = #tpu.dot_dimension_numbers<[1], [0], [0], [1], [0, 0, 1, 1], [], []>} : vector<8x256xbf16>, vector<256x256xbf16>, vector<8x256xf32> -> vector<8x256xf32>
    %129 = vector.broadcast %120 : vector<1x256xf32> to vector<8x256xf32>
    %130 = arith.addf %128, %129 : vector<8x256xf32>
    %cst_66 = arith.constant 0.000000e+00 : f32
    %131 = vector.broadcast %cst_66 : f32 to vector<8x256xf32>
    %132 = arith.maximumf %130, %131 : vector<8x256xf32>
    %c2 = arith.constant 2 : index
    %c0_67 = arith.constant 0 : index
    %c0_68 = arith.constant 0 : index
    %133 = vector.load %arg13[%c2, %c0_67, %c0_68] : memref<4x256x256xbf16, #tpu.memory_space<vmem>>, vector<1x256x256xbf16>
    %134 = vector.shape_cast %133 : vector<1x256x256xbf16> to vector<256x256xbf16>
    %c2_69 = arith.constant 2 : index
    %c0_70 = arith.constant 0 : index
    %c0_71 = arith.constant 0 : index
    %135 = vector.load %arg14[%c2_69, %c0_70, %c0_71] : memref<4x1x256xf32, #tpu.memory_space<vmem>>, vector<1x1x256xf32>
    %136 = vector.shape_cast %135 : vector<1x1x256xf32> to vector<1x256xf32>
    %137 = arith.truncf %126 : vector<8x256xf32> to vector<8x256xbf16>
    %cst_72 = arith.constant dense<0.000000e+00> : vector<8x256xf32>
    %138 = tpu.matmul %137, %134, %cst_72 {dimension_numbers = #tpu.dot_dimension_numbers<[1], [0], [0], [1], [0, 0, 1, 1], [], []>} : vector<8x256xbf16>, vector<256x256xbf16>, vector<8x256xf32> -> vector<8x256xf32>
    %139 = vector.broadcast %136 : vector<1x256xf32> to vector<8x256xf32>
    %140 = arith.addf %138, %139 : vector<8x256xf32>
    %cst_73 = arith.constant 0.000000e+00 : f32
    %141 = vector.broadcast %cst_73 : f32 to vector<8x256xf32>
    %142 = arith.maximumf %140, %141 : vector<8x256xf32>
    %143 = arith.truncf %132 : vector<8x256xf32> to vector<8x256xbf16>
    %cst_74 = arith.constant dense<0.000000e+00> : vector<8x256xf32>
    %144 = tpu.matmul %143, %134, %cst_74 {dimension_numbers = #tpu.dot_dimension_numbers<[1], [0], [0], [1], [0, 0, 1, 1], [], []>} : vector<8x256xbf16>, vector<256x256xbf16>, vector<8x256xf32> -> vector<8x256xf32>
    %145 = vector.broadcast %136 : vector<1x256xf32> to vector<8x256xf32>
    %146 = arith.addf %144, %145 : vector<8x256xf32>
    %cst_75 = arith.constant 0.000000e+00 : f32
    %147 = vector.broadcast %cst_75 : f32 to vector<8x256xf32>
    %148 = arith.maximumf %146, %147 : vector<8x256xf32>
    %c3 = arith.constant 3 : index
    %c0_76 = arith.constant 0 : index
    %c0_77 = arith.constant 0 : index
    %149 = vector.load %arg13[%c3, %c0_76, %c0_77] : memref<4x256x256xbf16, #tpu.memory_space<vmem>>, vector<1x256x256xbf16>
    %150 = vector.shape_cast %149 : vector<1x256x256xbf16> to vector<256x256xbf16>
    %c3_78 = arith.constant 3 : index
    %c0_79 = arith.constant 0 : index
    %c0_80 = arith.constant 0 : index
    %151 = vector.load %arg14[%c3_78, %c0_79, %c0_80] : memref<4x1x256xf32, #tpu.memory_space<vmem>>, vector<1x1x256xf32>
    %152 = vector.shape_cast %151 : vector<1x1x256xf32> to vector<1x256xf32>
    %153 = arith.truncf %142 : vector<8x256xf32> to vector<8x256xbf16>
    %cst_81 = arith.constant dense<0.000000e+00> : vector<8x256xf32>
    %154 = tpu.matmul %153, %150, %cst_81 {dimension_numbers = #tpu.dot_dimension_numbers<[1], [0], [0], [1], [0, 0, 1, 1], [], []>} : vector<8x256xbf16>, vector<256x256xbf16>, vector<8x256xf32> -> vector<8x256xf32>
    %155 = vector.broadcast %152 : vector<1x256xf32> to vector<8x256xf32>
    %156 = arith.addf %154, %155 : vector<8x256xf32>
    %cst_82 = arith.constant 0.000000e+00 : f32
    %157 = vector.broadcast %cst_82 : f32 to vector<8x256xf32>
    %158 = arith.maximumf %156, %157 : vector<8x256xf32>
    %159 = arith.truncf %148 : vector<8x256xf32> to vector<8x256xbf16>
    %cst_83 = arith.constant dense<0.000000e+00> : vector<8x256xf32>
    %160 = tpu.matmul %159, %150, %cst_83 {dimension_numbers = #tpu.dot_dimension_numbers<[1], [0], [0], [1], [0, 0, 1, 1], [], []>} : vector<8x256xbf16>, vector<256x256xbf16>, vector<8x256xf32> -> vector<8x256xf32>
    %161 = vector.broadcast %152 : vector<1x256xf32> to vector<8x256xf32>
    %162 = arith.addf %160, %161 : vector<8x256xf32>
    %cst_84 = arith.constant 0.000000e+00 : f32
    %163 = vector.broadcast %cst_84 : f32 to vector<8x256xf32>
    %164 = arith.maximumf %162, %163 : vector<8x256xf32>
    %c0_85 = arith.constant 0 : index
    %c0_86 = arith.constant 0 : index
    %165 = vector.load %arg16[%c0_85, %c0_86] : memref<1x8xf32, #tpu.memory_space<vmem>>, vector<1x8xf32>
    %c0_87 = arith.constant 0 : index
    %c0_88 = arith.constant 0 : index
    %c0_89 = arith.constant 0 : index
    %166 = vector.load %arg15[%c0_87, %c0_88, %c0_89] : memref<2x256x8xbf16, #tpu.memory_space<vmem>>, vector<1x256x8xbf16>
    %167 = vector.shape_cast %166 : vector<1x256x8xbf16> to vector<256x8xbf16>
    %168 = arith.truncf %158 : vector<8x256xf32> to vector<8x256xbf16>
    %cst_90 = arith.constant dense<0.000000e+00> : vector<8x8xf32>
    %169 = tpu.matmul %168, %167, %cst_90 {dimension_numbers = #tpu.dot_dimension_numbers<[1], [0], [0], [1], [0, 0, 1, 1], [], []>} : vector<8x256xbf16>, vector<256x8xbf16>, vector<8x8xf32> -> vector<8x8xf32>
    %170 = vector.broadcast %165 : vector<1x8xf32> to vector<8x8xf32>
    %171 = arith.addf %170, %169 : vector<8x8xf32>
    %c1_91 = arith.constant 1 : index
    %c0_92 = arith.constant 0 : index
    %c0_93 = arith.constant 0 : index
    %172 = vector.load %arg15[%c1_91, %c0_92, %c0_93] : memref<2x256x8xbf16, #tpu.memory_space<vmem>>, vector<1x256x8xbf16>
    %173 = vector.shape_cast %172 : vector<1x256x8xbf16> to vector<256x8xbf16>
    %174 = arith.truncf %164 : vector<8x256xf32> to vector<8x256xbf16>
    %cst_94 = arith.constant dense<0.000000e+00> : vector<8x8xf32>
    %175 = tpu.matmul %174, %173, %cst_94 {dimension_numbers = #tpu.dot_dimension_numbers<[1], [0], [0], [1], [0, 0, 1, 1], [], []>} : vector<8x256xbf16>, vector<256x8xbf16>, vector<8x8xf32> -> vector<8x8xf32>
    %176 = arith.addf %171, %175 : vector<8x8xf32>
    %cst_95 = arith.constant 0.000000e+00 : f32
    %177 = vector.broadcast %cst_95 : f32 to vector<8x8xf32>
    %178 = arith.maximumf %176, %177 : vector<8x8xf32>
    %179 = math.absf %176 : vector<8x8xf32>
    %cst_96 = arith.constant 0.000000e+00 : f32
    %180 = vector.broadcast %cst_96 : f32 to vector<8x8xf32>
    %181 = arith.subf %180, %179 : vector<8x8xf32>
    %182 = math.exp %181 : vector<8x8xf32>
    %cst_97 = arith.constant 1.000000e+00 : f32
    %183 = vector.broadcast %cst_97 : f32 to vector<8x8xf32>
    %184 = arith.addf %183, %182 : vector<8x8xf32>
    %185 = math.log %184 : vector<8x8xf32>
    %186 = arith.addf %178, %185 : vector<8x8xf32>
    %187 = arith.mulf %186, %33 : vector<8x8xf32>
    %cst_98 = arith.constant dense<0.000000e+00> : vector<8xf32>
    %188 = vector.multi_reduction <add>, %187, %cst_98 [1] : vector<8x8xf32> to vector<8xf32>
    %189 = vector.shape_cast %188 : vector<8xf32> to vector<8x1xf32>
    %c0_99 = arith.constant 0 : index
    %c0_100 = arith.constant 0 : index
    %190 = vector.load %arg18[%c0_99, %c0_100] : memref<8x1xf32, #tpu.memory_space<vmem>>, vector<8x1xf32>
    tpu.vector_store %arg18[%c0_99, %c0_100], %189 {strides = array<i32>} : memref<8x1xf32, #tpu.memory_space<vmem>>, vector<8x1xf32>,
    return
  }
  func.func @transform_0(%arg0: i32) -> (i32, i32) {
    %c0_i32 = arith.constant 0 : i32
    %c0_i32_0 = arith.constant 0 : i32
    return %arg0, %c0_i32 : i32, i32
  }
  func.func @transform_1(%arg0: i32) -> (i32, i32) {
    %c0_i32 = arith.constant 0 : i32
    %c0_i32_0 = arith.constant 0 : i32
    return %arg0, %c0_i32 : i32, i32
  }
  func.func @transform_2(%arg0: i32) -> (i32, i32) {
    %c0_i32 = arith.constant 0 : i32
    %c0_i32_0 = arith.constant 0 : i32
    %c0_i32_1 = arith.constant 0 : i32
    return %c0_i32, %c0_i32_0 : i32, i32
  }
  func.func @transform_3(%arg0: i32) -> (i32, i32) {
    %c0_i32 = arith.constant 0 : i32
    %c0_i32_0 = arith.constant 0 : i32
    %c0_i32_1 = arith.constant 0 : i32
    return %c0_i32, %c0_i32_0 : i32, i32
  }
  func.func @transform_4(%arg0: i32) -> (i32, i32) {
    %c0_i32 = arith.constant 0 : i32
    %c0_i32_0 = arith.constant 0 : i32
    %c0_i32_1 = arith.constant 0 : i32
    return %c0_i32, %c0_i32_0 : i32, i32
  }
  func.func @transform_5(%arg0: i32) -> (i32, i32) {
    %c0_i32 = arith.constant 0 : i32
    %c0_i32_0 = arith.constant 0 : i32
    %c0_i32_1 = arith.constant 0 : i32
    return %c0_i32, %c0_i32_0 : i32, i32
  }
  func.func @transform_6(%arg0: i32) -> (i32, i32) {
    %c0_i32 = arith.constant 0 : i32
    %c0_i32_0 = arith.constant 0 : i32
    %c0_i32_1 = arith.constant 0 : i32
    return %c0_i32, %c0_i32_0 : i32, i32
  }
  func.func @transform_7(%arg0: i32) -> (i32, i32) {
    %c0_i32 = arith.constant 0 : i32
    %c0_i32_0 = arith.constant 0 : i32
    %c0_i32_1 = arith.constant 0 : i32
    return %c0_i32, %c0_i32_0 : i32, i32
  }
  func.func @transform_8(%arg0: i32) -> (i32, i32) {
    %c0_i32 = arith.constant 0 : i32
    %c0_i32_0 = arith.constant 0 : i32
    %c0_i32_1 = arith.constant 0 : i32
    return %c0_i32, %c0_i32_0 : i32, i32
  }
  func.func @transform_9(%arg0: i32) -> (i32, i32) {
    %c0_i32 = arith.constant 0 : i32
    %c0_i32_0 = arith.constant 0 : i32
    %c0_i32_1 = arith.constant 0 : i32
    return %c0_i32, %c0_i32_0 : i32, i32
  }
  func.func @transform_10(%arg0: i32) -> (i32, i32) {
    %c0_i32 = arith.constant 0 : i32
    %c0_i32_0 = arith.constant 0 : i32
    %c0_i32_1 = arith.constant 0 : i32
    return %c0_i32, %c0_i32_0 : i32, i32
  }
  func.func @transform_11(%arg0: i32) -> (i32, i32) {
    %c0_i32 = arith.constant 0 : i32
    %c0_i32_0 = arith.constant 0 : i32
    %c0_i32_1 = arith.constant 0 : i32
    return %c0_i32, %c0_i32_0 : i32, i32
  }
  func.func @transform_12(%arg0: i32) -> (i32, i32, i32) {
    %c0_i32 = arith.constant 0 : i32
    %c0_i32_0 = arith.constant 0 : i32
    %c0_i32_1 = arith.constant 0 : i32
    %c0_i32_2 = arith.constant 0 : i32
    return %c0_i32, %c0_i32_0, %c0_i32_1 : i32, i32, i32
  }
  func.func @transform_13(%arg0: i32) -> (i32, i32, i32) {
    %c0_i32 = arith.constant 0 : i32
    %c0_i32_0 = arith.constant 0 : i32
    %c0_i32_1 = arith.constant 0 : i32
    %c0_i32_2 = arith.constant 0 : i32
    return %c0_i32, %c0_i32_0, %c0_i32_1 : i32, i32, i32
  }
  func.func @transform_14(%arg0: i32) -> (i32, i32, i32) {
    %c0_i32 = arith.constant 0 : i32
    %c0_i32_0 = arith.constant 0 : i32
    %c0_i32_1 = arith.constant 0 : i32
    %c0_i32_2 = arith.constant 0 : i32
    return %c0_i32, %c0_i32_0, %c0_i32_1 : i32, i32, i32
  }
  func.func @transform_15(%arg0: i32) -> (i32, i32) {
    %c0_i32 = arith.constant 0 : i32
    %c0_i32_0 = arith.constant 0 : i32
    %c0_i32_1 = arith.constant 0 : i32
    return %c0_i32, %c0_i32_0 : i32, i32
  }
  func.func @transform_16(%arg0: i32) -> (i32, i32) {
    %c0_i32 = arith.constant 0 : i32
    %c0_i32_0 = arith.constant 0 : i32
    return %arg0, %c0_i32 : i32, i32
  }
  func.func @transform_17(%arg0: i32) -> (i32, i32) {
    %c0_i32 = arith.constant 0 : i32
    %c0_i32_0 = arith.constant 0 : i32
    return %arg0, %c0_i32 : i32, i32
  }
}

</mosaic_0001>

<bundles_post_ra>
// kernel: tpu_custom_call.1
= control target key start
LH: loop header
LB: loop body
LE: loop exit
PB: predicated region body
PF: predicated region fallthrough
CT: control target
= control target key end

     0   :  { %s5612_s0 = inlined_call_operand.vmem [shape: f32[16,10], index: 0, kind: input, shape index: {}]   ;;  %s5613_s1 = inlined_call_operand.vmem [shape: f32[16,2], index: 1, kind: input, shape index: {}]   ;;  %s5614_s2 = inlined_call_operand.vmem [shape: bf16[10,32], index: 2, kind: input, shape index: {}]   ;;  %s5615_s3 = inlined_call_operand.vmem [shape: f32[1,32], index: 3, kind: input, shape index: {}]   ;;  %s5616_s4 = inlined_call_operand.vmem [shape: bf16[32,32], index: 4, kind: input, shape index: {}]   ;;  %s5617_s5 = inlined_call_operand.vmem [shape: f32[1,32], index: 5, kind: input, shape index: {}]   ;;  %s5618_s6 = inlined_call_operand.vmem [shape: bf16[32,32], index: 6, kind: input, shape index: {}]   ;;  %s5619_s7 = inlined_call_operand.vmem [shape: f32[1,32], index: 7, kind: input, shape index: {}]   ;;  %s5620_s8 = inlined_call_operand.vmem [shape: bf16[32,32], index: 8, kind: input, shape index: {}]   ;;  %s5621_s9 = inlined_call_operand.vmem [shape: f32[1,32], index: 9, kind: input, shape index: {}]   ;;  %s5622_s10 = inlined_call_operand.hbm [shape: bf16[216,512], index: 10, kind: input, shape index: {}]   ;;  %s5623_s11 = inlined_call_operand.vmem [shape: f32[1,512], index: 11, kind: input, shape index: {}]   ;;  %s5624_s12 = inlined_call_operand.hbm [shape: bf16[4,256,256], index: 12, kind: input, shape index: {}]   ;;  %s5625_s13 = inlined_call_operand.vmem [shape: f32[4,1,256], index: 13, kind: input, shape index: {}]   ;;  %s5626_s14 = inlined_call_operand.vmem [shape: bf16[2,256,8], index: 14, kind: input, shape index: {}]   ;;  %s5627_s15 = inlined_call_operand.vmem [shape: f32[1,8], index: 15, kind: input, shape index: {}]   ;;  %s5628_s16 = inlined_call_operand.vmem [shape: f32[16,8], index: 16, kind: output, shape index: {0}]   ;;  %s5629_s17 = inlined_call_operand.vmem [shape: f32[16,1], index: 17, kind: output, shape index: {1}]  }
   0x1   :  { %5633 = sst [smem:[#allocation9_spill]] %s5612_s0 }
   0x2   :  { %5634 = sst [smem:[#allocation10_spill]] %s5613_s1 }
   0x3   :  { %5635 = sst [smem:[#allocation11_spill]] %s5629_s17 }
   0x4   :  { %23 = vsyncpa [#allocation3], 0 }
   0x5   :  { %24 = vsyncpa [#allocation5], 0  ;;  %s4932_s24 = smov 0  }
   0x6 LB: > { %5636 = sst [smem:[#allocation8_spill]] %s4814_s24  ;;  %s4816_s25 = smov [#allocation2]   ;;  %s4814_s24 = sphi %s4932_s24, %s30_s24  }
   0x7   : > { %s469_s26 = sshll.u32 %s4816_s25, 4  ;;  %s4938_s27 = sadd.s32 4294967295, %s4814_s24   ;;  %s470_s26 = int_to_ptr.vmem [resolvable:$true] %s469_s26 }
   0x8   : > { %p3933_p0 = scmp.ge.s32.totalorder %s4814_s24, 1  ;;  %p433_p1 = scmp.lt.s32.totalorder %s4814_s24, 3 }
   0x9   : > { %p5630_p3 = scmp.eq.s32.totalorder %s4938_s27, 0  ;;  %s4817_s29 = smov [#allocation4]  }
   0xa   : > { %p4942_p2 = pnand %p3933_p0, %p433_p1  ;;  %s485_s0 = sshll.u32 %s4817_s29, 4  ;;  %s4955_s0 = int_to_ptr.vmem [resolvable:$true] %s485_s0 }
   0xb   : > { %s4744_s1 = scalar_lea.hbm %s5622_s10, 6912 }
   0xc   : > { %s5637_s28 = scalar_select %p4942_p2, 1, 0 }
   0xd   : > { %p4358_p4 = pneg %p4942_p2  ;;  %p4745_p6 = scmp.ne.s32.totalorder %s5622_s10, %s4744_s1 }
   0xe   : > { %p4751_p10 = scmp.lt.u32.totalorder %s4744_s1, %s5622_s10 }
   0xf   : > { %p4951_p5 = pnand %p5630_p3, %p4358_p4 }
  0x11   : > { %p4746_p7 = pneg %p4951_p5 }
  0x13   : > { %p4747_p8 = pnand %p4746_p7, %p4745_p6 }
  0x15   : > { %p4748_p9 = pneg %p4747_p8 }
  0x17   : > { %p4753_p11 = pnand %p4751_p10, %p4748_p9 }
  0x19   : > { %4756 = shalt.err (!%p4753_p11)
}
  0x1a   : > { %s4757_s25 = scalar_lea.vmem %s470_s26, 6912  ;;  %p4765_p1 = scmp.lt.s32.totalorder %s470_s26, %s470_s26 }
  0x1b   : > { %p4758_p12 = scmp.ne.s32.totalorder %s470_s26, %s4757_s25  ;;  %p4766_p4 = scmp.lt.s32.totalorder %s4757_s25, %s4757_s25 }
  0x1d   : > { %p4760_p13 = pnand %p4758_p12, %p4746_p7  ;;  %p4767_p3 = por %p4766_p4, %p4765_p1 }
  0x1f   : > { %p4761_p0 = pneg %p4760_p13 }
  0x21   : > { %p4768_p2 = pnand %p4767_p3, %p4761_p0 }
  0x23   : > { %4771 = shalt.err (!%p4768_p2)
}
  0x24   : > { %s4818_s29 = smov 256   ;;  %s4819_s18 = smov 16  }
  0x25   : > { %4361 = dma.hbm_to_vmem [thread:$0]  (!%p4951_p5), %s5622_s10, 6912, %s470_s26, [#allocation3], %s4818_s29, %s4818_s29, %s4819_s18  }
  0x26   : > { %s4772_s22 = scalar_lea.hbm %s5624_s12, 16384 }
  0x27   : > { %p4773_p6 = scmp.ne.s32.totalorder %s5624_s12, %s4772_s22  ;;  %p4779_p8 = scmp.lt.u32.totalorder %s4772_s22, %s5624_s12 }
  0x29   : > { %p4775_p2 = pnand %p4773_p6, %p4746_p7 }
  0x2b   : > { %p4776_p3 = pneg %p4775_p2 }
  0x2d   : > { %p4781_p9 = pnand %p4779_p8, %p4776_p3 }
  0x2f   : > { %4784 = shalt.err (!%p4781_p9)
}
  0x30   : > { %s4785_s26 = scalar_lea.vmem %s4955_s0, 16384  ;;  %p4793_p13 = scmp.lt.s32.totalorder %s4955_s0, %s4955_s0 }
  0x31   : > { %p4786_p10 = scmp.ne.s32.totalorder %s4955_s0, %s4785_s26  ;;  %p4794_p0 = scmp.lt.s32.totalorder %s4785_s26, %s4785_s26 }
  0x33   : > { %p4788_p11 = pnand %p4786_p10, %p4746_p7  ;;  %p4795_p1 = por %p4794_p0, %p4793_p13 }
  0x35   : > { %p4789_p12 = pneg %p4788_p11 }
  0x37   : > { %p4796_p4 = pnand %p4795_p1, %p4789_p12 }
  0x39   : > { %4799 = shalt.err (!%p4796_p4)
}
  0x3a   : > { %s4820_s17 = smov 128   ;;  %s4821_s24 = smov 8  }
  0x3b   : > { %4364 = dma.hbm_to_vmem [thread:$0]  (!%p4951_p5), %s5624_s12, 16384, %s4955_s0, [#allocation5], %s4820_s17, %s4820_s17, %s4821_s24  }
  0x3c   : > { %p5639_p6 = scmp.ne.s32.totalorder %s5637_s28, 0 }
  0x3d   : > { %p5640_p7 = scmp.eq.s32.totalorder (!%p5639_p6), %s4938_s27, 0 }
  0x3e   : > { %524 = sbr.rel (%p5639_p6) target bundleno = 3206 (0xc86), region = 84 }
  0x45   : > { %4805 = dma.done.wait (%p5640_p7), [#allocation3], 6912   ;;  %p5641_p2 = pmov %p5640_p7 }
  0x47   : > { %4807 = vsyncadd (%p5641_p2), [#allocation3], 4294960384  ;;  %p5642_p3 = pmov %p5641_p2 }
  0x48   : > { %p5643_p8 = pmov %p5641_p2 }
  0x49   : > { %4809 = dma.done.wait (%p5642_p3), [#allocation5], 16384  }
  0x4a   : > { %4811 = vsyncadd (%p5643_p8), [#allocation5], 4294950912  ;;  %p586_p9 = scmp.lt.s32.totalorder %s4938_s27, 1  ;;  %v4822_v0 = vmov 0.0   ;;  %vm4823_vm0 = vmmov 0   ;;  %s5644_s19 = sld [smem:[#allocation9_spill]] }
  0x4b   : > { %4304 = vmatprep.subr.bf16.mxu0 %v4822_v0  ;;  %4306 = vmatprep.mubr.msk.bf16.mxu0 %vm4823_vm0, %v4822_v0  ;;  %vm623_vm1 = vcmask 1044480   ;;  %v4405_v1 = vld [vmem:[%s5614_s2] sm:$0x1f]   ;;  %vm619_vm2 = vcmask 80896   ;;  %v4407_v6 = vld [vmem:[%s5616_s4 + $0x8] sm:$0xff]   ;;  %vm692_vm3 = vcmask 261120  }
  0x4c   : > { %s5653_s27 = smov (!%p586_p9, %s4938_s27), 1  ;;  %4310 = vmatprep.subr.bf16.mxu1 %v4822_v0  ;;  %4314 = vmatprep.mubr.msk.bf16.mxu1 %vm4823_vm0, %v4822_v0  ;;  %v625_v3 = vsel %vm623_vm1, %v4405_v1, 0  ;;  %v4406_v5 = vld [vmem:[%s5616_s4] sm:$0xff]   ;;  %v4409_v16 = vld [vmem:[%s5618_s6 + $0x8] sm:$0xff]   ;;  %v4824_v35 = vmov 1   ;;  %s5645_s29 = sld [smem:[#allocation10_spill]] }
  0x4d   : > { %s5018_s28 = sshll.u32 %s5653_s27, 3  ;;  %4305 = vmatpush3.bf16.msra.mxu0 %v625_v3  ;;  %4311 = vmatpush3.bf16.msra.mxu1 %v4406_v5  ;;  %v4408_v7 = vld [vmem:[%s5618_s6] sm:$0xff]   ;;  %v4411_v26 = vld [vmem:[%s5620_s8 + $0x8] sm:$0xff]   ;;  %s4825_s0 = smov 120   ;;  %v4826_v44 = vmov 0   ;;  %vm921_vm4 = vcmask 64512  }
  0x4e   : > { %4318 = vmatprep.subr.bf16.mxu0 %v4822_v0  ;;  %4312 = vmatprep.subr.bf16.mxu1 %v4822_v0  ;;  %v3944_v8 = vld [vmem:[%s5615_s3] ss:$0 sm:$0xff]  ;;  %s4827_s30 = smov 8   ;;  %vm935_vm5 = vcmask 130048   ;;  %s4836_s20 = smov 16  }
  0x4f   : > { %v4410_v17 = vld [vmem:[%s5620_s8] sm:$0xff]   ;;  %4403 = vset.pattern.permute.xlu0 %v4824_v35  ;;  %4404 = vset.pattern.permute.xlu1 %v4826_v44  ;;  %s4837_s21 = smov 40   ;;  %s4838_s27 = smov 64  }
  0x50   : > { %s589_s1 = scalar_lea.vmem %s5644_s19, %s5018_s28  ;;  %v3947_v18 = vld [vmem:[%s5617_s5] ss:$0 sm:$0xff]  ;;  %s4834_s19 = smov 48  }
  0x51   : > { %v603_v2 = vld [vmem:[%s589_s1] sm:$0xff]  ;;  %4313 = vmatpush3.bf16.msra.mxu1 %v4407_v6  ;;  %s4835_s1 = smov 24   ;;  %s4839_s22 = smov 104  }
  0x52   : > { %v606_v4 = vpack.c.bf16 %v603_v2, %v603_v2  ;;  %4326 = vmatprep.subr.bf16.mxu1 %v4822_v0  ;;  %v3951_v27 = vld [vmem:[%s5619_s7] ss:$0 sm:$0xff]  ;;  %s593_s18 = scalar_lea.vmem %s5645_s29, %s5018_s28  ;;  %s4840_s23 = smov 72  }
  0x53   : > { %v3955_v36 = vld [vmem:[%s5621_s9] ss:$0 sm:$0xff]  ;;  %s4841_s25 = smov 96   ;;  %s597_s24 = scalar_lea.vmem %s5628_s16, %s5018_s28 }
  0x54   : > { %4307 = vmatmul.mubr.msk.bf16.vlgmr.msra.gmra.mrb[0].mxu0 %vm619_vm2, %v606_v4  ;;  %v893_v43 = vld [vmem:[%s593_s18] sm:$0xff] }
  0x55   : > { %4322 = vmatprep.mubr.msk.bf16.mxu0 %vm4823_vm0, %v4822_v0  ;;  %4319 = vmatpush3.bf16.msra.mxu0 %v4408_v7 }
  0x56   : > { %4320 = vmatprep.subr.bf16.mxu0 %v4822_v0 }
  0x59   : > { %4321 = vmatpush3.bf16.msra.mxu0 %v4409_v16 }
 0x127   : > { %v661_v9 = vpop.f32.mrb[0].mxu0 }
 0x128   : > { %v662_v10 = vadd.f32 %v3944_v8, %v661_v9  ;;  %v4308_v11 = vpop.f32.mrb[1].mxu0 }
 0x129   : > { %v664_v12 = vpop.f32.mrb[2].mxu0 }
 0x12a   : > { %v667_v13 = vmax.f32 %v662_v10, 0.0  ;;  %v4309_v14 = vpop.f32.mrb[3].mxu0 }
 0x12c   : > { %v672_v15 = vpack.c.bf16 %v667_v13, %v667_v13 }
 0x12e   : > { %4315 = vmatmul.mubr.msk.bf16.vlgmr.msra.gmra.mrb[0].mxu1 %vm692_vm3, %v672_v15 }
 0x12f   : > { %4330 = vmatprep.mubr.msk.bf16.mxu1 %vm4823_vm0, %v4822_v0  ;;  %4327 = vmatpush3.bf16.msra.mxu1 %v4410_v17 }
 0x130   : > { %4328 = vmatprep.subr.bf16.mxu1 %v4822_v0 }
 0x133   : > { %4329 = vmatpush3.bf16.msra.mxu1 %v4411_v26 }
 0x201   : > { %v730_v19 = vpop.f32.mrb[0].mxu1 }
 0x202   : > { %v731_v20 = vadd.f32 %v3947_v18, %v730_v19  ;;  %v4316_v21 = vpop.f32.mrb[1].mxu1 }
 0x203   : > { %v733_v22 = vpop.f32.mrb[2].mxu1 }
 0x204   : > { %v736_v23 = vmax.f32 %v731_v20, 0.0  ;;  %v4317_v24 = vpop.f32.mrb[3].mxu1 }
 0x206   : > { %v741_v25 = vpack.c.bf16 %v736_v23, %v736_v23 }
 0x208   : > { %4323 = vmatmul.mubr.msk.bf16.vlgmr.msra.gmra.mrb[4].mxu0 %vm692_vm3, %v741_v25 }
 0x2db   : > { %v798_v28 = vpop.f32.mrb[4].mxu0 }
 0x2dc   : > { %v799_v29 = vadd.f32 %v3951_v27, %v798_v28  ;;  %v4324_v30 = vpop.f32.mrb[5].mxu0 }
 0x2dd   : > { %v801_v31 = vpop.f32.mrb[6].mxu0 }
 0x2de   : > { %v804_v32 = vmax.f32 %v799_v29, 0.0  ;;  %v4325_v33 = vpop.f32.mrb[7].mxu0 }
 0x2e0   : > { %v809_v34 = vpack.c.bf16 %v804_v32, %v804_v32 }
 0x2e2   : > { %4331 = vmatmul.mubr.msk.bf16.vlgmr.msra.gmra.mrb[4].mxu1 %vm692_vm3, %v809_v34  ;;  %v4828_v34 = vmov 683565275  }
 0x3b5   : > { %v866_v37 = vpop.f32.mrb[4].mxu1 }
 0x3b6   : > { %v5062_v38 = vadd.f32 %v3955_v36, %v866_v37  ;;  %v4332_v39 = vpop.f32.mrb[5].mxu1  ;;  %v4829_v36 = vmov 2475754826  }
 0x3b7   : > { %v869_v40 = vpop.f32.mrb[6].mxu1  ;;  %v4830_v39 = vmov 2131351028  }
 0x3b8   : > { %v4333_v41 = vpop.f32.mrb[7].mxu1  ;;  %v879_v42 = vmul.f32 %v5062_v38, %v5062_v38  ;;  %v873_v59 = vsub.f32 0.0, %v5062_v38 }
 0x3b9   : > { %v4831_v41 = vmov 2102212464  }
 0x3ba   : > { %881 = vrot.lane.b32.xlu0 %v879_v42, %s4825_s0  ;;  %v874_v60 = vmul.f32 1.442695, %v873_v59 }
 0x3be   : > { %901 = vperm.xlu0 %4403, %v893_v43  }
 0x42c   : > { %v882_v45 = vpop.permute.xlu0 %881 }
 0x42d   : > { %v884_v46 = vadd.f32 %v882_v45, %v879_v42 }
 0x42f   : > { %v885_v47 = vmax.f32 %v884_v46, 1e-24 }
 0x431   : > { %4718 = vrsqrt.f32 %v885_v47 }
 0x432   : > { %4720 = vpow2.f32 %v874_v60 }
 0x43b   : > { %v4719_v48 = vpop.eup %4718 }
 0x43c   : > { %889 = vrot.lane.b32.xlu1 %v4719_v48, %s4827_s30  ;;  %v887_v49 = vmul.f32 %v4719_v48, %v5062_v38  ;;  %v4721_v61 = vpop.eup %4720 }
 0x43d   : > { %v902_v50 = vpop.permute.xlu0 %901  ;;  %v876_v62 = vadd.f32 1.0, %v4721_v61 }
 0x43e   : > { %v911_v51 = vmul.f32 %v902_v50, %v887_v49 }
 0x43f   : > { %4722 = vrcp.f32 %v876_v62 }
 0x440   : > { %896 = vperm.xlu1 %4404, %v893_v43   ;;  %913 = vrot.lane.b32.xlu0 %v911_v51, %s4827_s30  ;;  %v4832_v43 = vmov 920167782   ;;  %s5650_s30 = sld [smem:[#allocation11_spill]] }
 0x449   : > { %v5077_v2 = vpop.eup %4722 }
 0x4ae   : > { %v890_v52 = vpop.permute.xlu1 %889 }
 0x4af   : > { %v892_v53 = vmul.f32 %v890_v52, %v5062_v38 }
 0x4b1   : > { %v904_v54 = vmul.f32 %v902_v50, %v892_v53  ;;  %v4833_v50 = vmov 1326507024  }
 0x4b2   : > { %v914_v57 = vpop.permute.xlu0 %913 }
 0x4b3   : > { %906 = vrot.lane.b32.xlu1 %v904_v54, %s4825_s0 }
 0x4bf   : > { %v897_v55 = vpop.permute.xlu1 %896 }
 0x4c0   : > { %v910_v56 = vmul.f32 %v897_v55, %v892_v53  ;;  %v899_v63 = vmul.f32 %v897_v55, %v887_v49 }
 0x4c2   : > { %v916_v58 = vadd.f32 %v914_v57, %v910_v56 }
 0x4c4   : > { %928 = vrot.lane.b32.xlu0 %v916_v58, %s4825_s0 }
 0x525   : > { %v907_v0 = vpop.permute.xlu1 %906 }
 0x526   : > { %v909_v1 = vsub.f32 %v899_v63, %v907_v0 }
 0x528   : > { %924 = vrot.lane.b32.xlu1 %v909_v1, %s4825_s0 }
 0x52c   : > { %931 = vrot.lane.b32.xlu1 %v5077_v2, %s4825_s0 }
 0x536   : > { %v929_v4 = vpop.permute.xlu0 %928 }
 0x59a   : > { %v925_v3 = vpop.permute.xlu1 %924 }
 0x59b   : > { %v934_v5 = vsel %vm921_vm4, %v925_v3, %v929_v4 }
 0x59e   : > { %v932_v6 = vpop.permute.xlu1 %931 }
 0x59f   : > { %v5083_v7 = vsel %vm935_vm5, %v934_v5, %v932_v6 }
 0x5a0   : > { %v940_v8 = vand.u32 2139095040, %v5083_v7  ;;  %v937_v9 = vand.u32 2147483647, %v5083_v7  ;;  %v5088_v10 = vmul.f32 4.0, %v5083_v7  ;;  %v5091_v11 = vmul.f32 8.0, %v5083_v7 }
 0x5a1   : > { %vm939_vm3 = vcmp.lt.s32.totalorder %v5083_v7, 0 }
 0x5a2   : > { %v941_v12 = vshrl.u32 %v940_v8, 23  ;;  %v944_v13 = vand.u32 8388607, %v937_v9  ;;  %v1353_v14 = vand.u32 2147483647, %v5088_v10  ;;  %v1356_v15 = vand.u32 2139095040, %v5088_v10 }
 0x5a3   : > { %v1564_v19 = vand.u32 2139095040, %v5091_v11  ;;  %v1561_v31 = vand.u32 2147483647, %v5091_v11 }
 0x5a4   : > { %v3959_v16 = vadd.s32 4294967169, %v941_v12  ;;  %v1357_v17 = vshrl.u32 %v1356_v15, 23  ;;  %v1360_v18 = vand.u32 8388607, %v1353_v14  ;;  %v945_v21 = vor.u32 8388608, %v944_v13 }
 0x5a5   : > { %v1565_v24 = vshrl.u32 %v1564_v19, 23 }
 0x5a6   : > { %v947_v20 = vadd.s32 1, %v3959_v16  ;;  %v3975_v22 = vadd.s32 4294967169, %v1357_v17  ;;  %v1361_v23 = vor.u32 8388608, %v1360_v18  ;;  %v5100_v29 = vshll.u32 %v945_v21, 8 }
 0x5a7   : > { %v3983_v32 = vadd.s32 4294967169, %v1565_v24 }
 0x5a8   : > { %vm948_vm6 = vcmp.gt.s32.totalorder %v947_v20, 0  ;;  %v1363_v26 = vadd.s32 1, %v3975_v22  ;;  %v5102_v30 = vshll.u32 %v1361_v23, 8 }
 0x5a9   : > { %v949_v25 = vsel %vm948_vm6, %v947_v20, 0  ;;  %v5124_v8 = vadd.s32 1, %v3983_v32  ;;  %v4412_v32 = vld [vmem:[#allocation2] ss:$16 sps:$4 sm:$0xff]   ;;  %vm5214_vm6 = vcmp.le.f32.partialorder %v937_v9, 0.7853982 }
 0x5aa   : > { %v950_v27 = vshrl.u32 %v949_v25, 5  ;;  %v951_v28 = vand.u32 31, %v949_v25  ;;  %vm1364_vm7 = vcmp.gt.s32.totalorder %v1363_v26, 0 }
 0x5ab   : > { %v1365_v55 = vsel %vm1364_vm7, %v1363_v26, 0  ;;  %vm1572_vm1 = vcmp.gt.s32.totalorder %v5124_v8, 0 }
 0x5ac   : > { %v952_v33 = vsub.s32 32, %v951_v28  ;;  %v954_v35 = vshll.u32 %v4828_v34, %v951_v28  ;;  %v957_v37 = vshll.u32 %v4829_v36, %v951_v28  ;;  %v960_v40 = vshll.u32 %v4830_v39, %v951_v28 }
 0x5ad   : > { %v963_v42 = vshll.u32 %v4831_v41, %v951_v28  ;;  %v966_v44 = vshll.u32 %v4832_v43, %v951_v28  ;;  %vm969_vm8 = vcmp.lt.s32.totalorder %v950_v27, 1  ;;  %vm970_vm9 = vcmp.lt.s32.totalorder %v950_v27, 2 }
 0x5ae   : > { %v955_v45 = vshrl.u32 %v4829_v36, %v952_v33  ;;  %v958_v46 = vshrl.u32 %v4830_v39, %v952_v33  ;;  %v961_v47 = vshrl.u32 %v4831_v41, %v952_v33  ;;  %v953_v48 = vshrl.u32 %v4828_v34, %v952_v33 }
 0x5af   : > { %v964_v49 = vshrl.u32 %v4832_v43, %v952_v33  ;;  %v967_v51 = vshrl.u32 %v4833_v50, %v952_v33  ;;  %vm971_vm10 = vcmp.lt.s32.totalorder %v950_v27, 3  ;;  %vm972_vm11 = vcmp.lt.s32.totalorder %v950_v27, 4  ;;  %v4414_v33 = vld [vmem:[#allocation2 + $0x4] ss:$16 sps:$4 sm:$0xff]  }
 0x5b0   : > { %v956_v52 = vor.u32 %v955_v45, %v954_v35  ;;  %v959_v53 = vor.u32 %v958_v46, %v957_v37  ;;  %v962_v54 = vor.u32 %v961_v47, %v960_v40  ;;  %v1367_v58 = vand.u32 31, %v1365_v55  ;;  %2180 = vmatprep.subr.bf16.mxu0 %v4414_v33 }
 0x5b1   : > { %v965_v56 = vor.u32 %v964_v49, %v963_v42  ;;  %v968_v57 = vor.u32 %v967_v51, %v966_v44  ;;  %v5128_v15 = vshrl.u32 %v1365_v55, 5  ;;  %v4415_v42 = vld [vmem:[#allocation2 + $0x8] ss:$16 sps:$4 sm:$0xff]   ;;  %v4417_v44 = vld [vmem:[#allocation2 + $0xc] ss:$16 sps:$4 sm:$0xff]   ;;  %2181 = vmatpush1.bf16.msra.mxu0 %v4412_v32 }
 0x5b2   : > { %v973_v59 = vsel %vm969_vm8, %v953_v48, %v956_v52  ;;  %v974_v60 = vsel %vm972_vm11, %v962_v54, 2102212464  ;;  %v977_v61 = vsel %vm969_vm8, %v956_v52, %v959_v53  ;;  %v981_v62 = vsel %vm969_vm8, %v959_v53, %v962_v54  ;;  %v4420_v48 = vld [vmem:[#allocation2 + $0x24] ss:$16 sps:$4 sm:$0xff]   ;;  %2221 = vmatprep.subr.bf16.mxu1 %v4417_v44  ;;  %v4418_v52 = vld [vmem:[#allocation2 + $0x20] ss:$16 sps:$4 sm:$0xff]  }
 0x5b3   : > { %v975_v63 = vsel %vm971_vm10, %v959_v53, %v974_v60  ;;  %v978_v0 = vsel %vm972_vm11, %v965_v56, 920167782  ;;  %v982_v1 = vsel %vm972_vm11, %v968_v57, 1326507024  ;;  %v1368_v3 = vsub.s32 32, %v1367_v58  ;;  %2222 = vmatpush1.bf16.msra.mxu1 %v4415_v42  ;;  %2182 = vmatprep.subr.bf16.mxu0 %v4420_v48 }
 0x5b4   : > { %v976_v4 = vsel %vm970_vm9, %v973_v59, %v975_v63  ;;  %v979_v5 = vsel %vm971_vm10, %v962_v54, %v978_v0  ;;  %v983_v6 = vsel %vm971_vm10, %v965_v56, %v982_v1  ;;  %v1370_v16 = vshll.u32 %v4828_v34, %v1367_v58  ;;  %v4423_v53 = vld [vmem:[#allocation2 + $0x2c] ss:$16 sps:$4 sm:$0xff]   ;;  %v4421_v56 = vld [vmem:[#allocation2 + $0x28] ss:$16 sps:$4 sm:$0xff]   ;;  %v4426_v57 = vld [vmem:[#allocation2 + $0x44] ss:$16 sps:$4 sm:$0xff]  }
 0x5b5   : > { %v980_v12 = vsel %vm970_vm9, %v977_v61, %v979_v5  ;;  %v984_v13 = vsel %vm970_vm9, %v981_v62, %v983_v6  ;;  %v992_v21 = vmul.u32 %v5100_v29, %v976_v4  ;;  %v1371_v22 = vshrl.u32 %v4829_v36, %v1368_v3  ;;  %2223 = vmatprep.subr.bf16.mxu1 %v4423_v53  ;;  %v4429_v1 = vld [vmem:[#allocation2 + $0x4c] ss:$16 sps:$4 sm:$0xff]   ;;  %v4438_v42 = vld [vmem:[#allocation2 + $0x84] ss:$16 sps:$4 sm:$0xff]  }
 0x5b6   : > { %v5132_v17 = vmul.u32.u64.low %v5100_v29, %v984_v13  ;;  %v5133_v18 = vmul.u32.u64.high %v5100_v29, %v984_v13, %v5132_v17  ;;  %v5136_v19 = vmul.u32.u64.low %v5100_v29, %v980_v12  ;;  %v5137_v20 = vmul.u32.u64.high %v5100_v29, %v980_v12, %v5136_v19  ;;  %2183 = vmatpush1.bf16.msra.mxu0 %v4418_v52  ;;  %v4424_v12 = vld [vmem:[#allocation2 + $0x40] ss:$16 sps:$4 sm:$0xff]   ;;  %v4441_v44 = vld [vmem:[#allocation2 + $0x8c] ss:$16 sps:$4 sm:$0xff]   ;;  %v4444_v53 = vld [vmem:[#allocation2 + $0xa4] ss:$16 sps:$4 sm:$0xff]  }
 0x5b7   : > { %v1373_v23 = vshll.u32 %v4829_v36, %v1367_v58  ;;  %v1374_v24 = vshrl.u32 %v4830_v39, %v1368_v3  ;;  %v1376_v25 = vshll.u32 %v4830_v39, %v1367_v58  ;;  %v1377_v26 = vshrl.u32 %v4831_v41, %v1368_v3  ;;  %2224 = vmatpush1.bf16.msra.mxu1 %v4421_v56 }
 0x5b8   : > { %v1379_v27 = vshll.u32 %v4831_v41, %v1367_v58  ;;  %v1380_v28 = vshrl.u32 %v4832_v43, %v1368_v3  ;;  %v1372_v35 = vor.u32 %v1371_v22, %v1370_v16  ;;  %v1382_v29 = vshll.u32 %v4832_v43, %v1367_v58  ;;  %2184 = vmatprep.subr.bf16.mxu0 %v4426_v57 }
 0x5b9   : > { %v1375_v37 = vor.u32 %v1374_v24, %v1373_v23  ;;  %v1383_v40 = vshrl.u32 %v4833_v50, %v1368_v3  ;;  %vm994_vm12 = vc.u32 %v5133_v18, %v5136_v19  ;;  %v995_v45 = vadd.s32 1, %v5137_v20  ;;  %2225 = vmatprep.subr.bf16.mxu1 %v4429_v1 }
 0x5ba   : > { %v1369_v46 = vshrl.u32 %v4828_v34, %v1368_v3  ;;  %v1378_v47 = vor.u32 %v1377_v26, %v1376_v25  ;;  %v1381_v49 = vor.u32 %v1380_v28, %v1379_v27  ;;  %vm1385_vm13 = vcmp.lt.s32.totalorder %v5128_v15, 1  ;;  %v4435_v26 = vld [vmem:[#allocation2 + $0x6c] ss:$16 sps:$4 sm:$0xff]   ;;  %2185 = vmatpush1.bf16.msra.mxu0 %v4424_v12 }
 0x5bb   : > { %v1384_v51 = vor.u32 %v1383_v40, %v1382_v29  ;;  %vm1386_vm14 = vcmp.lt.s32.totalorder %v5128_v15, 2  ;;  %v996_v54 = vsel %vm994_vm12, %v995_v45, %v5137_v20  ;;  %vm1387_vm15 = vcmp.lt.s32.totalorder %v5128_v15, 3  ;;  %v4427_v20 = vld [vmem:[#allocation2 + $0x48] ss:$16 sps:$4 sm:$0xff]  }
 0x5bc   : > { %vm1388_vm0 = vcmp.lt.s32.totalorder %v5128_v15, 4  ;;  %v1393_v55 = vsel %vm1385_vm13, %v1372_v35, %v1375_v37  ;;  %v997_v58 = vadd.s32 %v996_v54, %v992_v21  ;;  %v1397_v61 = vsel %vm1385_vm13, %v1375_v37, %v1378_v47  ;;  %v4432_v21 = vld [vmem:[#allocation2 + $0x64] ss:$16 sps:$4 sm:$0xff]   ;;  %2226 = vmatpush1.bf16.msra.mxu1 %v4427_v20 }
 0x5bd   : > { %v1390_v59 = vsel %vm1388_vm0, %v1378_v47, 2102212464  ;;  %v1394_v60 = vsel %vm1388_vm0, %v1381_v49, 920167782  ;;  %v1389_v62 = vsel %vm1385_vm13, %v1369_v46, %v1372_v35  ;;  %v1398_v0 = vsel %vm1388_vm0, %v1384_v51, 1326507024  ;;  %2186 = vmatprep.subr.bf16.mxu0 %v4432_v21  ;;  %2227 = vmatprep.subr.bf16.mxu1 %v4435_v26 }
 0x5be   : > { %v1395_v63 = vsel %vm1387_vm15, %v1378_v47, %v1394_v60  ;;  %v998_v3 = vadd.s32 536870912, %v997_v58  ;;  %v1391_v4 = vsel %vm1387_vm15, %v1375_v37, %v1390_v59  ;;  %v1399_v6 = vsel %vm1387_vm15, %v1381_v49, %v1398_v0  ;;  %v4430_v35 = vld [vmem:[#allocation2 + $0x60] ss:$16 sps:$4 sm:$0xff]  }
 0x5bf   : > { %v1396_v5 = vsel %vm1386_vm14, %v1393_v55, %v1395_v63  ;;  %v1400_v13 = vsel %vm1386_vm14, %v1397_v61, %v1399_v6  ;;  %v1573_v25 = vsel %vm1572_vm1, %v5124_v8, 0  ;;  %v1392_v27 = vsel %vm1386_vm14, %v1389_v62, %v1391_v4  ;;  %v4433_v8 = vld [vmem:[#allocation2 + $0x68] ss:$16 sps:$4 sm:$0xff]   ;;  %2187 = vmatpush1.bf16.msra.mxu0 %v4430_v35  ;;  %v4436_v51 = vld [vmem:[#allocation2 + $0x80] ss:$16 sps:$4 sm:$0xff]  }
 0x5c0   : > { %v5177_v16 = vmul.u32.u64.low %v5102_v30, %v1396_v5  ;;  %v5178_v17 = vmul.u32.u64.high %v5102_v30, %v1396_v5, %v5177_v16  ;;  %v5181_v22 = vshrl.u32 %v998_v3, 30  ;;  %v1568_v28 = vand.u32 8388607, %v1561_v31  ;;  %2228 = vmatpush1.bf16.msra.mxu1 %v4433_v8  ;;  %2188 = vmatprep.subr.bf16.mxu0 %v4438_v42  ;;  %v4447_v55 = vld [vmem:[#allocation2 + $0xac] ss:$16 sps:$4 sm:$0xff]  }
 0x5c1   : > { %v5184_v23 = vmul.u32.u64.low %v5102_v30, %v1400_v13  ;;  %v5185_v24 = vmul.u32.u64.high %v5102_v30, %v1400_v13, %v5184_v23  ;;  %v5195_v33 = vand.u32 31, %v1573_v25  ;;  %v5199_v29 = vmul.f32 2.0, %v5083_v7  ;;  %2229 = vmatprep.subr.bf16.mxu1 %v4441_v44  ;;  %v4442_v0 = vld [vmem:[#allocation2 + $0xa0] ss:$16 sps:$4 sm:$0xff]   ;;  %v4445_v5 = vld [vmem:[#allocation2 + $0xa8] ss:$16 sps:$4 sm:$0xff]  }
 0x5c2   : > { %v1000_v32 = vshll.u32 %v5181_v22, 30  ;;  %v1411_v37 = vadd.s32 1, %v5178_v17  ;;  %v1408_v15 = vmul.u32 %v5102_v30, %v1392_v27  ;;  %v1569_v46 = vor.u32 8388608, %v1568_v28  ;;  %v4439_v30 = vld [vmem:[#allocation2 + $0x88] ss:$16 sps:$4 sm:$0xff]  }
 0x5c3   : > { %vm1410_vm2 = vc.u32 %v5185_v24, %v5177_v16  ;;  %v1576_v49 = vsub.s32 32, %v5195_v33  ;;  %v1148_v52 = vand.u32 2139095040, %v5199_v29  ;;  %v1145_v59 = vand.u32 2147483647, %v5199_v29  ;;  %2189 = vmatpush1.bf16.msra.mxu0 %v4436_v51  ;;  %v4450_v6 = vld [vmem:[#allocation2 + $0xc4] ss:$16 sps:$4 sm:$0xff]  }
 0x5c4   : > { %v5201_v40 = vsub.s32 %v997_v58, %v1000_v32  ;;  %v1412_v45 = vsel %vm1410_vm2, %v1411_v37, %v5178_v17  ;;  %v5218_v58 = vshll.u32 %v1569_v46, 8  ;;  %v1023_v61 = vsub.s32 4, %v5181_v22  ;;  %2230 = vmatpush1.bf16.msra.mxu1 %v4439_v30  ;;  %2190 = vmatprep.subr.bf16.mxu0 %v4444_v53  ;;  %v4448_v32 = vld [vmem:[#allocation2 + $0xc0] ss:$16 sps:$4 sm:$0xff]   ;;  %v4451_v42 = vld [vmem:[#allocation2 + $0xc8] ss:$16 sps:$4 sm:$0xff]  }
 0x5c5   : > { %v1413_v48 = vadd.s32 %v1412_v45, %v1408_v15  ;;  %v5222_v62 = vshrl.u32 %v1573_v25, 5  ;;  %v1579_v63 = vshrl.u32 %v4829_v36, %v1576_v49  ;;  %v993_v9 = vadd.s32 %v5136_v19, %v5133_v18  ;;  %2231 = vmatprep.subr.bf16.mxu1 %v4447_v55  ;;  %v4453_v18 = vld [vmem:[#allocation2 + $0xcc] ss:$16 sps:$4 sm:$0xff]   ;;  %v4456_v44 = vld [vmem:[#allocation2 + $0xe4] ss:$16 sps:$4 sm:$0xff]  }
 0x5c6   : > { %v1003_v47 = vsub.s32 0, %v5201_v40  ;;  %v1585_v3 = vshrl.u32 %v4831_v41, %v1576_v49  ;;  %v5230_v4 = vshrl.u32 %v1148_v52, 23  ;;  %v1578_v13 = vshll.u32 %v4828_v34, %v5195_v33  ;;  %v4459_v51 = vld [vmem:[#allocation2 + $0xec] ss:$16 sps:$4 sm:$0xff]  }
 0x5c7   : > { %v1414_v57 = vadd.s32 536870912, %v1413_v48  ;;  %v1582_v17 = vshrl.u32 %v4830_v39, %v1576_v49  ;;  %v1588_v20 = vshrl.u32 %v4832_v43, %v1576_v49  ;;  %v1581_v21 = vshll.u32 %v4829_v36, %v5195_v33  ;;  %2191 = vmatpush1.bf16.msra.mxu0 %v4442_v0 }
 0x5c8   : > { %v3960_v54 = vmin.u32 %v1003_v47, %v5201_v40  ;;  %v1584_v23 = vshll.u32 %v4830_v39, %v5195_v33  ;;  %v1591_v25 = vshrl.u32 %v4833_v50, %v1576_v49  ;;  %v1024_v26 = vsel %vm939_vm3, %v1023_v61, %v5181_v22  ;;  %2232 = vmatpush1.bf16.msra.mxu1 %v4445_v5  ;;  %v4465_v5 = vld [vmem:[#allocation2 + $0x10c] ss:$16 sps:$4 sm:$0xff]  }
 0x5c9   : > { %v5227_v1 = vshrl.u32 %v1414_v57, 30  ;;  %v1580_v27 = vor.u32 %v1579_v63, %v1578_v13  ;;  %v1587_v28 = vshll.u32 %v4831_v41, %v5195_v33  ;;  %v1590_v15 = vshll.u32 %v4832_v43, %v5195_v33  ;;  %2192 = vmatprep.subr.bf16.mxu0 %v4450_v6  ;;  %2233 = vmatprep.subr.bf16.mxu1 %v4453_v18  ;;  %v4454_v57 = vld [vmem:[#allocation2 + $0xe0] ss:$16 sps:$4 sm:$0xff]  }
 0x5ca   : > { %v1005_v60 = vclz %v3960_v54  ;;  %v1586_v8 = vor.u32 %v1585_v3, %v1584_v23  ;;  %v1583_v22 = vor.u32 %v1582_v17, %v1581_v21  ;;  %v5253_v52 = vsel %vm5214_vm6, 0, %v1024_v26  ;;  %v4460_v21 = vld [vmem:[#allocation2 + $0x100] ss:$16 sps:$4 sm:$0xff]  }
 0x5cb   : > { %v1416_v19 = vshll.u32 %v5227_v1, 30  ;;  %v1589_v47 = vor.u32 %v1588_v20, %v1587_v28  ;;  %v1577_v30 = vshrl.u32 %v4828_v34, %v1576_v49  ;;  %v1592_v53 = vor.u32 %v1591_v25, %v1590_v15  ;;  %2193 = vmatpush1.bf16.msra.mxu0 %v4448_v32  ;;  %v4462_v49 = vld [vmem:[#allocation2 + $0x104] ss:$16 sps:$4 sm:$0xff]   ;;  %v4463_v32 = vld [vmem:[#allocation2 + $0x108] ss:$16 sps:$4 sm:$0xff]  }
 0x5cc   : > { %v3961_v12 = vadd.s32 4294967294, %v1005_v60  ;;  %vm1596_vm8 = vcmp.lt.s32.totalorder %v5222_v62, 4  ;;  %v4457_v60 = vld [vmem:[#allocation2 + $0xe8] ss:$16 sps:$4 sm:$0xff]   ;;  %vm1593_vm9 = vcmp.lt.s32.totalorder %v5222_v62, 1  ;;  %vm1595_vm10 = vcmp.lt.s32.totalorder %v5222_v62, 3  ;;  %2234 = vmatpush1.bf16.msra.mxu1 %v4451_v42  ;;  %2194 = vmatprep.subr.bf16.mxu0 %v4456_v44 }
 0x5cd   : > { %v5247_v37 = vsub.s32 %v1413_v48, %v1416_v19  ;;  %v1598_v63 = vsel %vm1596_vm8, %v1586_v8, 2102212464  ;;  %v1602_v3 = vsel %vm1596_vm8, %v1589_v47, 920167782  ;;  %2235 = vmatprep.subr.bf16.mxu1 %v4459_v51  ;;  %v1605_v13 = vsel %vm1593_vm9, %v1583_v22, %v1586_v8  ;;  %v4471_v44 = vld [vmem:[#allocation2 + $0x12c] ss:$16 sps:$4 sm:$0xff]  }
 0x5ce   : > { %vm3962_vm7 = vcmp.lt.s32.totalorder %v3961_v12, 0  ;;  %v1606_v17 = vsel %vm1596_vm8, %v1592_v53, 1326507024  ;;  %vm1594_vm11 = vcmp.lt.s32.totalorder %v5222_v62, 2  ;;  %v1597_v18 = vsel %vm1593_vm9, %v1577_v30, %v1580_v27  ;;  %v4466_v53 = vld [vmem:[#allocation2 + $0x120] ss:$16 sps:$4 sm:$0xff]  }
 0x5cf   : > { %v1008_v35 = vsel %vm3962_vm7, 0, %v3961_v12  ;;  %v1419_v48 = vsub.s32 0, %v5247_v37  ;;  %v1603_v12 = vsel %vm1595_vm10, %v1586_v8, %v1602_v3  ;;  %v1599_v19 = vsel %vm1595_vm10, %v1583_v22, %v1598_v63  ;;  %2195 = vmatpush1.bf16.msra.mxu0 %v4454_v57  ;;  %v4469_v57 = vld [vmem:[#allocation2 + $0x128] ss:$16 sps:$4 sm:$0xff]  }
 0x5d0   : > { %v1009_v45 = vsub.s32 32, %v1008_v35  ;;  %v1013_v46 = vsub.s32 4294967266, %v1008_v35  ;;  %v1010_v33 = vshll.u32 %v5201_v40, %v1008_v35  ;;  %v1607_v28 = vsel %vm1595_vm10, %v1589_v47, %v1606_v17  ;;  %2236 = vmatpush1.bf16.msra.mxu1 %v4457_v60  ;;  %2196 = vmatprep.subr.bf16.mxu0 %v4462_v49  ;;  %v4468_v35 = vld [vmem:[#allocation2 + $0x124] ss:$16 sps:$4 sm:$0xff]  }
 0x5d1   : > { %v3976_v61 = vmin.u32 %v1419_v48, %v5247_v37  ;;  %vm1355_vm12 = vcmp.lt.s32.totalorder %v5088_v10, 0  ;;  %2237 = vmatprep.subr.bf16.mxu1 %v4465_v5  ;;  %v1409_v51 = vadd.s32 %v5177_v16, %v5185_v24  ;;  %v3967_v30 = vadd.s32 4294967169, %v5230_v4 }
 0x5d2   : > { %v1011_v54 = vshrl.u32 %v993_v9, %v1009_v45  ;;  %v1014_v55 = vadd.s32 127, %v1013_v46  ;;  %v1601_v9 = vsel %vm1593_vm9, %v1580_v27, %v1583_v22  ;;  %v1608_v27 = vsel %vm1594_vm11, %v1605_v13, %v1607_v28  ;;  %v4472_v28 = vld [vmem:[#allocation2 + $0x140] ss:$16 sps:$4 sm:$0xff]  }
 0x5d3   : > { %v1421_v6 = vclz %v3976_v61  ;;  %v1604_v26 = vsel %vm1594_vm11, %v1601_v9, %v1603_v12  ;;  %v1600_v45 = vsel %vm1594_vm11, %v1597_v18, %v1599_v19  ;;  %2197 = vmatpush1.bf16.msra.mxu0 %v4460_v21  ;;  %v1439_v62 = vsub.s32 4, %v5227_v1 }
 0x5d4   : > { %v1012_v40 = vor.u32 %v1011_v54, %v1010_v33  ;;  %v1015_v0 = vshll.u32 %v1014_v55, 23  ;;  %v5287_v15 = vmul.u32.u64.low %v5218_v58, %v1604_v26  ;;  %v5288_v42 = vmul.u32.u64.high %v5218_v58, %v1604_v26, %v5287_v15  ;;  %2238 = vmatpush1.bf16.msra.mxu1 %v4463_v32  ;;  %2198 = vmatprep.subr.bf16.mxu0 %v4468_v35  ;;  %v4474_v32 = vld [vmem:[#allocation2 + $0x144] ss:$16 sps:$4 sm:$0xff]  }
 0x5d5   : > { %v3977_v25 = vadd.s32 4294967294, %v1421_v6  ;;  %v5294_v46 = vmul.u32.u64.low %v5218_v58, %v1608_v27  ;;  %v5295_v22 = vmul.u32.u64.high %v5218_v58, %v1608_v27, %v5294_v46  ;;  %v1030_v33 = vadd.s32 3, %v5253_v52  ;;  %2239 = vmatprep.subr.bf16.mxu1 %v4471_v44  ;;  %v4477_v44 = vld [vmem:[#allocation2 + $0x14c] ss:$16 sps:$4 sm:$0xff]  }
 0x5d6   : > { %v1016_v20 = vor.u32 4788187, %v1015_v0  ;;  %v1019_v23 = vcvt.s32.f32 %v1012_v40  ;;  %v1616_v61 = vmul.u32 %v5218_v58, %v1600_v45  ;;  %v1619_v63 = vadd.s32 1, %v5288_v42 }
 0x5d7   : > { %vm3978_vm13 = vcmp.lt.s32.totalorder %v3977_v25, 0  ;;  %v1155_v16 = vadd.s32 1, %v3967_v30  ;;  %vm1618_vm14 = vc.u32 %v5295_v22, %v5287_v15  ;;  %v5312_v9 = vand.u32 8388607, %v1145_v59  ;;  %2199 = vmatpush1.bf16.msra.mxu0 %v4466_v53 }
 0x5d8   : > { %v1017_v8 = vand.u32 2147483647, %v1016_v20  ;;  %v1424_v48 = vsel %vm3978_vm13, 0, %v3977_v25  ;;  %v1620_v0 = vsel %vm1618_vm14, %v1619_v63, %v5288_v42  ;;  %2240 = vmatpush1.bf16.msra.mxu1 %v4469_v57  ;;  %v5318_v6 = vand.u32 3, %v5253_v52  ;;  %v4475_v42 = vld [vmem:[#allocation2 + $0x148] ss:$16 sps:$4 sm:$0xff]   ;;  %2200 = vmatprep.subr.bf16.mxu0 %v4474_v32 }
 0x5d9   : > { %v1425_v54 = vsub.s32 32, %v1424_v48  ;;  %v1429_v55 = vsub.s32 4294967266, %v1424_v48  ;;  %v1426_v24 = vshll.u32 %v5247_v37, %v1424_v48  ;;  %vm1156_vm15 = vcmp.gt.s32.totalorder %v1155_v16, 0  ;;  %2241 = vmatprep.subr.bf16.mxu1 %v4477_v44 }
 0x5da   : > { %v1020_v47 = vmul.f32 %v1019_v23, %v1017_v8  ;;  %v1621_v5 = vadd.s32 %v1620_v0, %v1616_v61  ;;  %v5320_v12 = vand.u32 3, %v1030_v33  ;;  %v1157_v13 = vsel %vm1156_vm15, %v1155_v16, 0 }
 0x5db   : > { %v1427_v4 = vshrl.u32 %v1409_v51, %v1425_v54  ;;  %v1430_v49 = vadd.s32 127, %v1429_v55  ;;  %v1440_v20 = vsel %vm1355_vm12, %v1439_v62, %v5227_v1  ;;  %vm5327_vm0 = vcmp.le.f32.partialorder %v1353_v14, 0.7853982  ;;  %2201 = vmatpush1.bf16.msra.mxu0 %v4472_v28 }
 0x5dc   : > { %v1021_v60 = vxor.u32 2147483648, %v1020_v47  ;;  %v1622_v18 = vadd.s32 536870912, %v1621_v5  ;;  %v1159_v19 = vand.u32 31, %v1157_v13  ;;  %v1153_v25 = vor.u32 8388608, %v5312_v9  ;;  %2242 = vmatpush1.bf16.msra.mxu1 %v4475_v42  ;;  %v4483_v42 = vld [vmem:[#allocation2 + $0x16c] ss:$16 sps:$4 sm:$0xff]  }
 0x5dd   : > { %v1428_v37 = vor.u32 %v1427_v4, %v1426_v24  ;;  %v1431_v3 = vshll.u32 %v1430_v49, 23  ;;  %vm1139_vm1 = vcmp.eq.s32.totalorder %v5318_v6, 2  ;;  %v1442_v26 = vsel %vm5327_vm0, 0, %v1440_v20  ;;  %2243 = vmatprep.subr.bf16.mxu1 %v4483_v42 }
 0x5de   : > { %v1022_v40 = vsel %vm939_vm3, %v1021_v60, %v1020_v47  ;;  %v5331_v23 = vshrl.u32 %v1622_v18, 30  ;;  %v1160_v1 = vsub.s32 32, %v1159_v19  ;;  %vm1136_vm2 = vcmp.eq.s32.totalorder %v5318_v6, 0 }
 0x5df   : > { %v1025_v58 = vsel %vm5214_vm6, %v5083_v7, %v1022_v40  ;;  %v1432_v17 = vor.u32 4788187, %v1431_v3  ;;  %v1435_v52 = vcvt.s32.f32 %v1428_v37  ;;  %vm1033_vm3 = vcmp.eq.s32.totalorder %v5320_v12, 0 }
 0x5e0   : > { %4724 = vcosq.f32 %v1025_v58  ;;  %v1624_v35 = vshll.u32 %v5331_v23, 30  ;;  %v1162_v8 = vshll.u32 %v4828_v34, %v1159_v19  ;;  %v1165_v27 = vshll.u32 %v4829_v36, %v1159_v19 }
 0x5e1   : > { %4726 = vsinq.f32 %v1025_v58  ;;  %v1433_v21 = vand.u32 2147483647, %v1432_v17  ;;  %vm1135_vm6 = vcmp.lt.s32.totalorder %v5318_v6, 2  ;;  %vm1032_vm7 = vcmp.lt.s32.totalorder %v5320_v12, 2 }
 0x5e2   : > { %v1163_v45 = vshrl.u32 %v4829_v36, %v1160_v1  ;;  %v1166_v46 = vshrl.u32 %v4830_v39, %v1160_v1  ;;  %v1168_v47 = vshll.u32 %v4830_v39, %v1159_v19  ;;  %v1169_v51 = vshrl.u32 %v4831_v41, %v1160_v1 }
 0x5e3   : > { %v1436_v14 = vmul.f32 %v1435_v52, %v1433_v21  ;;  %vm1029_vm8 = vweird.f32 %v5083_v7  ;;  %v5349_v30 = vsub.s32 %v1621_v5, %v1624_v35  ;;  %v1171_v53 = vshll.u32 %v4831_v41, %v1159_v19  ;;  %v4480_v21 = vld [vmem:[#allocation2 + $0x164] ss:$16 sps:$4 sm:$0xff]  }
 0x5e4   : > { %v1172_v33 = vshrl.u32 %v4832_v43, %v1160_v1  ;;  %v1446_v54 = vadd.s32 3, %v1442_v26  ;;  %v1164_v36 = vor.u32 %v1163_v45, %v1162_v8  ;;  %v1167_v55 = vor.u32 %v1166_v46, %v1165_v27  ;;  %2202 = vmatprep.subr.bf16.mxu0 %v4480_v21 }
 0x5e5   : > { %v1437_v48 = vxor.u32 2147483648, %v1436_v14  ;;  %v1170_v62 = vor.u32 %v1169_v51, %v1168_v47  ;;  %vm1036_vm9 = vcmp.eq.s32.totalorder %v5320_v12, 2  ;;  %v1627_v57 = vsub.s32 0, %v5349_v30  ;;  %v4481_v12 = vld [vmem:[#allocation2 + $0x168] ss:$16 sps:$4 sm:$0xff]  }
 0x5e6   : > { %v5357_v60 = vor.u32 %v1172_v33, %v1171_v53  ;;  %v5362_v63 = vshrl.u32 %v1157_v13, 5  ;;  %v1174_v16 = vshll.u32 %v4832_v43, %v1159_v19  ;;  %v1175_v24 = vshrl.u32 %v4833_v50, %v1160_v1  ;;  %2244 = vmatpush1.bf16.msra.mxu1 %v4481_v12 }
 0x5e7   : > { %v1438_v39 = vsel %vm1355_vm12, %v1437_v48, %v1436_v14  ;;  %v5366_v40 = vand.u32 3, %v1442_v26  ;;  %v3984_v0 = vmin.u32 %v1627_v57, %v5349_v30  ;;  %v5369_v37 = vand.u32 3, %v1446_v54 }
 0x5e8   : > { %v1441_v41 = vsel %vm5327_vm0, %v5088_v10, %v1438_v39  ;;  %v1176_v3 = vor.u32 %v1175_v24, %v1174_v16  ;;  %v1161_v50 = vshrl.u32 %v4828_v34, %v1160_v1  ;;  %vm1177_vm10 = vcmp.lt.s32.totalorder %v5362_v63, 1  ;;  %v4478_v34 = vld [vmem:[#allocation2 + $0x160] ss:$16 sps:$4 sm:$0xff]  }
 0x5e9   : > { %4728 = vcosq.f32 %v1441_v41  ;;  %v1629_v13 = vclz %v3984_v0  ;;  %vm1178_vm11 = vcmp.lt.s32.totalorder %v5362_v63, 2  ;;  %vm1555_vm12 = vcmp.eq.s32.totalorder %v5366_v40, 2  ;;  %2203 = vmatpush1.bf16.msra.mxu0 %v4478_v34 }
 0x5ea   : > { %v4725_v61 = vpop.eup %4724  ;;  %4730 = vsinq.f32 %v1441_v41  ;;  %vm1179_vm13 = vcmp.lt.s32.totalorder %v5362_v63, 3  ;;  %vm1552_vm14 = vcmp.eq.s32.totalorder %v5366_v40, 0  ;;  %vm1180_vm15 = vcmp.lt.s32.totalorder %v5362_v63, 4 }
 0x5eb   : > { %v4727_v4 = vpop.eup %4726  ;;  %v1037_v49 = vxor.u32 2147483648, %v4725_v61  ;;  %v3985_v19 = vadd.s32 4294967294, %v1629_v13  ;;  %v1181_v6 = vsel %vm1177_vm10, %v1161_v50, %v1164_v36  ;;  %vm1551_vm0 = vcmp.lt.s32.totalorder %v5366_v40, 2 }
 0x5ec   : > { %v1034_v58 = vxor.u32 2147483648, %v4727_v4  ;;  %v1182_v1 = vsel %vm1180_vm15, %v1170_v62, 2102212464  ;;  %v1185_v28 = vsel %vm1177_vm10, %v1164_v36, %v1167_v55  ;;  %v1186_v32 = vsel %vm1180_vm15, %v5357_v60, 920167782 }
 0x5ed   : > { %v1141_v5 = vsel %vm1139_vm1, %v1037_v49, %v4727_v4  ;;  %v1038_v43 = vsel %vm1036_vm9, %v1037_v49, %v4727_v4  ;;  %vm3986_vm1 = vcmp.lt.s32.totalorder %v3985_v19, 0  ;;  %v1183_v35 = vsel %vm1179_vm13, %v1167_v55, %v1182_v1 }
 0x5ee   : > { %v1138_v17 = vsel %vm1136_vm2, %v4725_v61, %v1034_v58  ;;  %v1035_v20 = vsel %vm1033_vm3, %v4725_v61, %v1034_v58  ;;  %v1632_v14 = vsel %vm3986_vm1, 0, %v3985_v19  ;;  %v1187_v8 = vsel %vm1179_vm13, %v1170_v62, %v1186_v32 }
 0x5ef   : > { %v1142_v18 = vsel %vm1135_vm6, %v1138_v17, %v1141_v5  ;;  %v1039_v56 = vsel %vm1032_vm7, %v1035_v20, %v1038_v43  ;;  %v1189_v27 = vsel %vm1177_vm10, %v1167_v55, %v1170_v62  ;;  %v1617_v44 = vadd.s32 %v5287_v15, %v5295_v22 }
 0x5f0   : > { %v1143_v52 = vsel %vm1029_vm8, nan, %v1142_v18  ;;  %v1040_v26 = vsel %vm1029_vm8, nan, %v1039_v56  ;;  %v1633_v45 = vsub.s32 32, %v1632_v14  ;;  %v1637_v46 = vsub.s32 4294967266, %v1632_v14 }
 0x5f1   : > { %1773 = vrot.lane.b32.xlu1 %v1143_v52, %s4834_s19  ;;  %1769 = vrot.lane.b32.xlu0 %v1040_v26, %s4835_s1  ;;  %v1184_v47 = vsel %vm1178_vm11, %v1181_v6, %v1183_v35  ;;  %vm1449_vm2 = vcmp.eq.s32.totalorder %v5369_v37, 0  ;;  %v1188_v51 = vsel %vm1178_vm11, %v1185_v28, %v1187_v8  ;;  %v1190_v48 = vsel %vm1180_vm15, %v1176_v3, 1326507024  ;;  %s601_s19 = scalar_lea.vmem %s5650_s30, %s5018_s28 }
 0x5f2   : > { %v1193_v53 = vshll.u32 %v1153_v25, 8  ;;  %v1634_v15 = vshll.u32 %v5349_v30, %v1632_v14  ;;  %v1635_v22 = vshrl.u32 %v1617_v44, %v1633_v45  ;;  %v1638_v54 = vadd.s32 127, %v1637_v46 }
 0x5f3   : > { %v4729_v33 = vpop.eup %4728  ;;  %v1191_v36 = vsel %vm1179_vm13, %v5357_v60, %v1190_v48  ;;  %vm1452_vm3 = vcmp.eq.s32.totalorder %v5369_v37, 2  ;;  %vm1448_vm6 = vcmp.lt.s32.totalorder %v5369_v37, 2  ;;  %vm1445_vm7 = vweird.f32 %v5088_v10 }
 0x5f4   : > { %v4731_v55 = vpop.eup %4730  ;;  %v1453_v62 = vxor.u32 2147483648, %v4729_v33  ;;  %v1192_v39 = vsel %vm1178_vm11, %v1189_v27, %v1191_v36  ;;  %v5427_v57 = vmul.u32.u64.low %v1193_v53, %v1188_v51  ;;  %v5428_v61 = vmul.u32.u64.high %v1193_v53, %v1188_v51, %v5427_v57 }
 0x5f5   : > { %v1450_v9 = vxor.u32 2147483648, %v4731_v55  ;;  %v1636_v25 = vor.u32 %v1635_v22, %v1634_v15  ;;  %v1639_v30 = vshll.u32 %v1638_v54, 23  ;;  %v1200_v17 = vmul.u32 %v1193_v53, %v1184_v47 }
 0x5f6   : > { %v1557_v41 = vsel %vm1555_vm12, %v1453_v62, %v4731_v55  ;;  %v1454_v16 = vsel %vm1452_vm3, %v1453_v62, %v4731_v55  ;;  %v5433_v24 = vmul.u32.u64.low %v1193_v53, %v1192_v39  ;;  %v5434_v60 = vmul.u32.u64.high %v1193_v53, %v1192_v39, %v5433_v24 }
 0x5f7   : > { %v1554_v4 = vsel %vm1552_vm14, %v4729_v33, %v1450_v9  ;;  %v1451_v63 = vsel %vm1449_vm2, %v4729_v33, %v1450_v9  ;;  %v1640_v49 = vor.u32 4788187, %v1639_v30  ;;  %v1203_v3 = vadd.s32 1, %v5428_v61 }
 0x5f8   : > { %v1558_v0 = vsel %vm1551_vm0, %v1554_v4, %v1557_v41  ;;  %v1455_v58 = vsel %vm1448_vm6, %v1451_v63, %v1454_v16  ;;  %v1643_v50 = vcvt.s32.f32 %v1636_v25  ;;  %v1201_v37 = vadd.s32 %v5427_v57, %v5434_v60 }
 0x5f9   : > { %v1559_v5 = vsel %vm1445_vm7, nan, %v1558_v0  ;;  %v1456_v43 = vsel %vm1445_vm7, nan, %v1455_v58  ;;  %v1641_v13 = vand.u32 2147483647, %v1640_v49  ;;  %vm1202_vm8 = vc.u32 %v5434_v60, %v5427_v57  ;;  %v4484_v58 = vld [vmem:[#allocation2 + $0x180] ss:$16 sps:$4 sm:$0xff]  }
 0x5fa   : > { %1789 = vrot.lane.b32.xlu1 %v1559_v5, %s4836_s20  ;;  %1785 = vrot.lane.b32.xlu0 %v1456_v43, %s4825_s0  ;;  %v1647_v40 = vsub.s32 4, %v5331_v23  ;;  %v1204_v20 = vsel %vm1202_vm8, %v1203_v3, %v5428_v61  ;;  %vm1563_vm9 = vcmp.lt.s32.totalorder %v5091_v11, 0  ;;  %vm1562_vm10 = vcmp.le.f32.partialorder %v1561_v31, 0.7853982  ;;  %v4486_v3 = vld [vmem:[#allocation2 + $0x184] ss:$16 sps:$4 sm:$0xff]  }
 0x5fb   : > { %v1644_v10 = vmul.f32 %v1643_v50, %v1641_v13  ;;  %v1205_v18 = vadd.s32 %v1204_v20, %v1200_v17  ;;  %vm1653_vm1 = vweird.f32 %v5091_v11  ;;  %vm1147_vm3 = vcmp.lt.s32.totalorder %v5199_v29, 0  ;;  %v4487_v5 = vld [vmem:[#allocation2 + $0x188] ss:$16 sps:$4 sm:$0xff]   ;;  %v4489_v43 = vld [vmem:[#allocation2 + $0x18c] ss:$16 sps:$4 sm:$0xff]   ;;  %2204 = vmatprep.subr.bf16.mxu0 %v4486_v3 }
 0x5fc   : > { %v1648_v21 = vsel %vm1563_vm9, %v1647_v40, %v5331_v23  ;;  %vm1146_vm6 = vcmp.le.f32.partialorder %v1145_v59, 0.7853982  ;;  %2245 = vmatprep.subr.bf16.mxu1 %v4489_v43  ;;  %2205 = vmatpush1.bf16.msra.mxu0 %v4484_v58  ;;  %v1867_v59 = vld [vmem:[#allocation2 + $0x1a0] sm:$0xff]  ;;  %v1868_v17 = vld [vmem:[#allocation2 + $0x1a8] sm:$0xff]  ;;  %v4524_v43 = vld [vmem:[#allocation4 + $0xa0] ss:$8 sps:$4 sm:$0xff]  }
 0x5fd   : > { %v1645_v56 = vxor.u32 2147483648, %v1644_v10  ;;  %v1206_v19 = vadd.s32 536870912, %v1205_v18  ;;  %v1650_v6 = vsel %vm1562_vm10, 0, %v1648_v21  ;;  %2246 = vmatpush1.bf16.msra.mxu1 %v4487_v5  ;;  %v4044_v40 = vcombine.high %v1867_v59, %v1867_v59  ;;  %v4523_v58 = vld [vmem:[#allocation4 + $0x94] ss:$8 sps:$4 sm:$0xff]  }
 0x5fe   : > { %v1654_v28 = vadd.s32 3, %v1650_v6  ;;  %v1758_v27 = vand.u32 3, %v1650_v6  ;;  %v4046_v20 = vcombine.high %v1868_v17, %v1868_v17  ;;  %v4521_v3 = vld [vmem:[#allocation4 + $0x90] ss:$8 sps:$4 sm:$0xff]   ;;  %v4526_v5 = vld [vmem:[#allocation4 + $0xa4] ss:$8 sps:$4 sm:$0xff]  }
 0x5ff   : > { %v1646_v34 = vsel %vm1563_vm9, %v1645_v56, %v1644_v10  ;;  %v1207_v26 = vshrl.u32 %v1206_v19, 30  ;;  %vm2167_vm9 = vcmask 1043456   ;;  %v4045_v19 = vcombine.low %v1868_v17, %v1868_v17  ;;  %v4535_v17 = vld [vmem:[#allocation4 + $0xd4] ss:$8 sps:$4 sm:$0xff]  }
 0x600   : > { %v1649_v52 = vsel %vm1562_vm10, %v5091_v11, %v1646_v34  ;;  %v1655_v35 = vand.u32 3, %v1654_v28  ;;  %vm1760_vm15 = vcmp.eq.s32.totalorder %v1758_v27, 0  ;;  %vm1763_vm0 = vcmp.eq.s32.totalorder %v1758_v27, 2  ;;  %v4496_v34 = vld [vmem:[#allocation4 + $0x4] ss:$8 sps:$4 sm:$0xff]   ;;  %4047 = vmatprep.subr.msk.bf16.mxu0 %vm2167_vm9, %v4044_v40  ;;  %4049 = vmatprep.subr.msk.bf16.mxu1 %vm2167_vm9, %v4046_v20 }
 0x601   : > { %4732 = vcosq.f32 %v1649_v52  ;;  %v1208_v12 = vshll.u32 %v1207_v26, 30  ;;  %vm1759_vm2 = vcmp.lt.s32.totalorder %v1758_v27, 2  ;;  %v1231_v11 = vsub.s32 4, %v1207_v26  ;;  %v4538_v40 = vld [vmem:[#allocation4 + $0xe4] ss:$8 sps:$4 sm:$0xff]  }
 0x602   : > { %4734 = vsinq.f32 %v1649_v52  ;;  %vm1656_vm11 = vcmp.lt.s32.totalorder %v1655_v35, 2  ;;  %vm1657_vm12 = vcmp.eq.s32.totalorder %v1655_v35, 0  ;;  %vm1660_vm13 = vcmp.eq.s32.totalorder %v1655_v35, 2  ;;  %v4541_v20 = vld [vmem:[#allocation4 + $0xf4] ss:$8 sps:$4 sm:$0xff]  }
 0x603   : > { %v1209_v1 = vsub.s32 %v1205_v18, %v1208_v12  ;;  %v1232_v60 = vsel %vm1147_vm3, %v1231_v11, %v1207_v26  ;;  %v4043_v18 = vcombine.low %v1867_v59, %v1867_v59  ;;  %v4511_v11 = vld [vmem:[#allocation4 + $0x54] ss:$8 sps:$4 sm:$0xff]   ;;  %v4530_v59 = vld [vmem:[#allocation4 + $0xc0] ss:$8 sps:$4 sm:$0xff]  }
 0x604   : > { %v1234_v49 = vsel %vm1146_vm6, 0, %v1232_v60  ;;  %v4512_v60 = vld [vmem:[#allocation4 + $0x60] ss:$8 sps:$4 sm:$0xff]  }
 0x605   : > { %v1211_v32 = vsub.s32 0, %v1209_v1  ;;  %v1238_v0 = vadd.s32 3, %v1234_v49  ;;  %v1342_v13 = vand.u32 3, %v1234_v49  ;;  %v2169_v26 = vsel %vm2167_vm9, %v4043_v18, 0  ;;  %v4520_v49 = vld [vmem:[#allocation4 + $0x84] ss:$8 sps:$4 sm:$0xff]  }
 0x606   : > { %2207 = vmatpush1.bf16.msra.mxu0 %v2169_v26  ;;  %v4539_v18 = vld [vmem:[#allocation4 + $0xf0] ss:$8 sps:$4 sm:$0xff]  }
 0x607   : > { %v3968_v14 = vmin.u32 %v1211_v32, %v1209_v1  ;;  %vm1343_vm7 = vcmp.lt.s32.totalorder %v1342_v13, 2  ;;  %vm1344_vm8 = vcmp.eq.s32.totalorder %v1342_v13, 0  ;;  %2472 = vmatprep.subr.bf16.mxu0 %v4496_v34  ;;  %v1871_v26 = vld [vmem:[%s5623_s11] sm:$0xf] }
 0x609   : > { %v1213_v8 = vclz %v3968_v14 }
 0x60b   : > { %v4733_v42 = vpop.eup %4732  ;;  %v3969_v45 = vadd.s32 4294967294, %v1213_v8 }
 0x60c   : > { %v4735_v44 = vpop.eup %4734  ;;  %v1661_v31 = vxor.u32 2147483648, %v4733_v42 }
 0x60d   : > { %v1658_v23 = vxor.u32 2147483648, %v4735_v44  ;;  %vm3970_vm14 = vcmp.lt.s32.totalorder %v3969_v45, 0 }
 0x60e   : > { %v1662_v46 = vsel %vm1660_vm13, %v1661_v31, %v4735_v44  ;;  %v1216_v51 = vsel %vm3970_vm14, 0, %v3969_v45  ;;  %v1765_v53 = vsel %vm1763_vm0, %v1661_v31, %v4735_v44  ;;  %vm1237_vm14 = vweird.f32 %v5199_v29 }
 0x60f   : > { %v1659_v47 = vsel %vm1657_vm12, %v4733_v42, %v1658_v23  ;;  %v1762_v48 = vsel %vm1760_vm15, %v4733_v42, %v1658_v23  ;;  %v1217_v15 = vsub.s32 32, %v1216_v51  ;;  %v1221_v22 = vsub.s32 4294967266, %v1216_v51 }
 0x610   : > { %v1663_v33 = vsel %vm1656_vm11, %v1659_v47, %v1662_v46  ;;  %v1218_v36 = vshll.u32 %v1209_v1, %v1216_v51  ;;  %v1766_v39 = vsel %vm1759_vm2, %v1762_v48, %v1765_v53  ;;  %vm1347_vm11 = vcmp.eq.s32.totalorder %v1342_v13, 2  ;;  %v4529_v13 = vld [vmem:[#allocation4 + $0xb4] ss:$8 sps:$4 sm:$0xff]  }
 0x611   : > { %v1664_v54 = vsel %vm1653_vm1, nan, %v1663_v33  ;;  %v1219_v55 = vshrl.u32 %v1201_v37, %v1217_v15  ;;  %v1222_v62 = vadd.s32 127, %v1221_v22  ;;  %v1767_v9 = vsel %vm1653_vm1, nan, %v1766_v39  ;;  %v4499_v39 = vld [vmem:[#allocation4 + $0x14] ss:$8 sps:$4 sm:$0xff]  }
 0x612   : > { %1793 = vrot.lane.b32.xlu1 %v1664_v54, %s4837_s21  ;;  %v2175_v1 = vsel %vm2167_vm9, %v4045_v19, 0  ;;  %vm1811_vm15 = vcmask 326656   ;;  %vm1813_vm0 = vcmask 523264   ;;  %vm2163_vm1 = vcmask 719872  }
 0x613   : > { %v1220_v57 = vor.u32 %v1219_v55, %v1218_v36  ;;  %v1223_v61 = vshll.u32 %v1222_v62, 23  ;;  %2248 = vmatpush1.bf16.msra.mxu1 %v2175_v1  ;;  %vm1800_vm2 = vcmask 195584   ;;  %v4494_v55 = vld [vmem:[#allocation4] ss:$8 sps:$4 sm:$0xff]   ;;  %v1873_v19 = vlaneseq }
 0x614   : > { %2517 = vmatprep.subr.bf16.mxu1 %v4496_v34 }
 0x615   : > { %v1224_v25 = vor.u32 4788187, %v1223_v61  ;;  %v1227_v41 = vcvt.s32.f32 %v1220_v57  ;;  %v4497_v57 = vld [vmem:[#allocation4 + $0x10] ss:$8 sps:$4 sm:$0xff]   ;;  %v4500_v61 = vld [vmem:[#allocation4 + $0x20] ss:$8 sps:$4 sm:$0xff]  }
 0x616   : > { %1797 = vrot.lane.b32.xlu1 %v1767_v9, %s4838_s27  ;;  %v4505_v9 = vld [vmem:[#allocation4 + $0x34] ss:$8 sps:$4 sm:$0xff]   ;;  %v1874_v34 = vshrl.u32 %v1873_v19, 7  ;;  %v2298_v19 = vld [vmem:[%s5625_s13] sm:$0x3] }
 0x617   : > { %v1225_v30 = vand.u32 2147483647, %v1224_v25  ;;  %v4503_v25 = vld [vmem:[#allocation4 + $0x30] ss:$8 sps:$4 sm:$0xff]  }
 0x619   : > { %v1228_v16 = vmul.f32 %v1227_v41, %v1225_v30  ;;  %v4508_v30 = vld [vmem:[#allocation4 + $0x44] ss:$8 sps:$4 sm:$0xff]   ;;  %v4506_v41 = vld [vmem:[#allocation4 + $0x40] ss:$8 sps:$4 sm:$0xff]  }
 0x61a   : > { %918 = vrot.lane.b32.xlu1 %v5077_v2, %s4839_s22  ;;  %v1239_v2 = vand.u32 3, %v1238_v0  ;;  %v4518_v0 = vld [vmem:[#allocation4 + $0x80] ss:$8 sps:$4 sm:$0xff]  }
 0x61b   : > { %v1229_v24 = vxor.u32 2147483648, %v1228_v16 }
 0x61c   : > { %vm1244_vm10 = vcmp.eq.s32.totalorder %v1239_v2, 2  ;;  %vm1241_vm12 = vcmp.eq.s32.totalorder %v1239_v2, 0  ;;  %vm1240_vm13 = vcmp.lt.s32.totalorder %v1239_v2, 2  ;;  %v4527_v2 = vld [vmem:[#allocation4 + $0xb0] ss:$8 sps:$4 sm:$0xff]  }
 0x61d   : > { %v1230_v4 = vsel %vm1147_vm3, %v1229_v24, %v1228_v16  ;;  %vm1802_vm3 = vcmask 392192   ;;  %v4509_v16 = vld [vmem:[#allocation4 + $0x50] ss:$8 sps:$4 sm:$0xff]   ;;  %v4514_v24 = vld [vmem:[#allocation4 + $0x64] ss:$8 sps:$4 sm:$0xff]  }
 0x61e   : > { %v1233_v63 = vsel %vm1146_vm6, %v5199_v29, %v1230_v4  ;;  %vm1806_vm6 = vcmask 785408   ;;  %v4517_v4 = vld [vmem:[#allocation4 + $0x74] ss:$8 sps:$4 sm:$0xff]  }
 0x61f   : > { %4736 = vcosq.f32 %v1233_v63 }
 0x620   : > { %4738 = vsinq.f32 %v1233_v63  ;;  %v4515_v63 = vld [vmem:[#allocation4 + $0x70] ss:$8 sps:$4 sm:$0xff]  }
 0x629   : > { %v4737_v50 = vpop.eup %4736 }
 0x62a   : > { %v4739_v37 = vpop.eup %4738  ;;  %v1245_v10 = vxor.u32 2147483648, %v4737_v50 }
 0x62b   : > { %v1242_v56 = vxor.u32 2147483648, %v4739_v37 }
 0x62c   : > { %v1246_v21 = vsel %vm1244_vm10, %v1245_v10, %v4739_v37  ;;  %v1349_v52 = vsel %vm1347_vm11, %v1245_v10, %v4739_v37  ;;  %v4533_v37 = vld [vmem:[#allocation4 + $0xd0] ss:$8 sps:$4 sm:$0xff]   ;;  %v4536_v10 = vld [vmem:[#allocation4 + $0xe0] ss:$8 sps:$4 sm:$0xff]  }
 0x62d   : > { %v1243_v6 = vsel %vm1241_vm12, %v4737_v50, %v1242_v56  ;;  %v1346_v12 = vsel %vm1344_vm8, %v4737_v50, %v1242_v56  ;;  %v4532_v50 = vld [vmem:[#allocation4 + $0xc4] ss:$8 sps:$4 sm:$0xff]   ;;  %vm3811_vm8 = vcmask 7168  }
 0x62e   : > { %v1247_v28 = vsel %vm1240_vm13, %v1243_v6, %v1246_v21  ;;  %v1350_v32 = vsel %vm1343_vm7, %v1346_v12, %v1349_v52  ;;  %vm1808_vm7 = vcmask 982016   ;;  %v4544_v56 = vld [vmem:[#allocation4 + $0x104] ss:$8 sps:$4 sm:$0xff]   ;;  %v5475_v21 = vsub.s32 0, %v1874_v34 }
 0x62f   : > { %v1248_v14 = vsel %vm1237_vm14, nan, %v1247_v28  ;;  %v1351_v35 = vsel %vm1237_vm14, nan, %v1350_v32  ;;  %v1883_v52 = vsub.s32 2, %v1874_v34  ;;  %v5480_v6 = vsub.s32 1, %v1874_v34 }
 0x630   : > { %1777 = vrot.lane.b32.xlu0 %v1248_v14, %s4840_s23  ;;  %v1887_v12 = vsub.s32 3, %v1874_v34  ;;  %v1876_v1 = vrot.slane %v1871_v26, %v5475_v21  ;;  %v2305_v34 = vrot.slane %v2298_v19, %v5475_v21 }
 0x631   : > { %v1884_v28 = vrot.slane %v1871_v26, %v1883_v52  ;;  %v1880_v32 = vrot.slane %v1871_v26, %v5480_v6  ;;  %v2309_v52 = vrot.slane %v2298_v19, %v5480_v6 }
 0x632   : > { %v1888_v14 = vrot.slane %v1871_v26, %v1887_v12 }
 0x634   : > { %1781 = vrot.lane.b32.xlu0 %v1351_v35, %s4841_s25 }
 0x663   : > { %v1774_v8 = vpop.permute.xlu1 %1773  ;;  %v1770_v27 = vpop.permute.xlu0 %1769 }
 0x664   : > { %v1801_v48 = vsel %vm1800_vm2, %v5083_v7, %v1770_v27  ;;  %v4502_v7 = vld [vmem:[#allocation4 + $0x24] ss:$8 sps:$4 sm:$0xff]  }
 0x665   : > { %v1803_v33 = vsel %vm1802_vm3, %v1801_v48, %v1774_v8 }
 0x66c   : > { %v1790_v42 = vpop.permute.xlu1 %1789  ;;  %v1786_v44 = vpop.permute.xlu0 %1785 }
 0x66d   : > { %v1810_v29 = vsel %vm935_vm5, %v1786_v44, %v1790_v42  ;;  %vm1804_vm5 = vcmask 588800  }
 0x684   : > { %v1794_v31 = vpop.permute.xlu1 %1793 }
 0x685   : > { %v1812_v45 = vsel %vm1811_vm15, %v1810_v29, %v1794_v31 }
 0x688   : > { %v1798_v23 = vpop.permute.xlu1 %1797 }
 0x689   : > { %v1814_v46 = vsel %vm1813_vm0, %v1812_v45, %v1798_v23 }
 0x68a   : > { %v1870_v47 = vpack.c.bf16 %v1814_v46, %v1814_v46 }
 0x68c   : > { %v919_v51 = vpop.permute.xlu1 %918  ;;  %4048 = vmatprep.mubr.msk.bf16.mxu0 %vm2163_vm1, %v1870_v47  ;;  %4050 = vmatprep.mubr.msk.bf16.mxu1 %vm2163_vm1, %v1870_v47 }
 0x68d   : > { %922 = vst.msk [vmem:[%s597_s24] sm:$0xff] %vm921_vm4, %v919_v51 }
 0x6a2   : > { %v1778_v53 = vpop.permute.xlu0 %1777 }
 0x6a3   : > { %v1805_v15 = vsel %vm1804_vm5, %v1803_v33, %v1778_v53 }
 0x6a6   : > { %v1782_v22 = vpop.permute.xlu0 %1781 }
 0x6a7   : > { %v1807_v54 = vsel %vm1806_vm6, %v1805_v15, %v1782_v22 }
 0x6a8   : > { %v1809_v36 = vsel %vm1808_vm7, %v1807_v54, %v1786_v44 }
 0x6a9   : > { %v1869_v62 = vpack.c.bf16 %v1809_v36, %v1809_v36  ;;  %v4542_v36 = vld [vmem:[#allocation4 + $0x100] ss:$8 sps:$4 sm:$0xff]  }
 0x6ab   : > { %2213 = vmatmul.mubr.bf16.vlgmr.msra.gmra.mrb[8].mxu0 %v1869_v62  ;;  %2254 = vmatmul.mubr.bf16.vlgmr.msra.gmra.mrb[8].mxu1 %v1869_v62 }
 0x6ac   : > { %2473 = vmatpush1.bf16.msra.mxu0 %v4494_v55  ;;  %2518 = vmatpush1.bf16.msra.mxu1 %v4494_v55 }
 0x6ad   : > { %2474 = vmatprep.subr.bf16.mxu0 %v4499_v39  ;;  %2519 = vmatprep.subr.bf16.mxu1 %v4499_v39  ;;  %v4547_v39 = vld [vmem:[#allocation4 + $0x114] ss:$8 sps:$4 sm:$0xff]  }
 0x6b0   : > { %2475 = vmatpush1.bf16.msra.mxu0 %v4497_v57  ;;  %2520 = vmatpush1.bf16.msra.mxu1 %v4497_v57  ;;  %v4545_v57 = vld [vmem:[#allocation4 + $0x110] ss:$8 sps:$4 sm:$0xff]  }
 0x6b1   : > { %2476 = vmatprep.subr.bf16.mxu0 %v4502_v7  ;;  %2521 = vmatprep.subr.bf16.mxu1 %v4502_v7  ;;  %v4550_v7 = vld [vmem:[#allocation4 + $0x124] ss:$8 sps:$4 sm:$0xff]  }
 0x6b4   : > { %2477 = vmatpush1.bf16.msra.mxu0 %v4500_v61  ;;  %2522 = vmatpush1.bf16.msra.mxu1 %v4500_v61  ;;  %v4548_v61 = vld [vmem:[#allocation4 + $0x120] ss:$8 sps:$4 sm:$0xff]  }
 0x6b5   : > { %2478 = vmatprep.subr.bf16.mxu0 %v4505_v9  ;;  %2523 = vmatprep.subr.bf16.mxu1 %v4505_v9  ;;  %v4553_v9 = vld [vmem:[#allocation4 + $0x134] ss:$8 sps:$4 sm:$0xff]  }
 0x6b8   : > { %2479 = vmatpush1.bf16.msra.mxu0 %v4503_v25  ;;  %2524 = vmatpush1.bf16.msra.mxu1 %v4503_v25  ;;  %v4551_v25 = vld [vmem:[#allocation4 + $0x130] ss:$8 sps:$4 sm:$0xff]  }
 0x6b9   : > { %2480 = vmatprep.subr.bf16.mxu0 %v4508_v30  ;;  %2525 = vmatprep.subr.bf16.mxu1 %v4508_v30  ;;  %v4556_v30 = vld [vmem:[#allocation4 + $0x144] ss:$8 sps:$4 sm:$0xff]  }
 0x6bc   : > { %2481 = vmatpush1.bf16.msra.mxu0 %v4506_v41  ;;  %2526 = vmatpush1.bf16.msra.mxu1 %v4506_v41  ;;  %v4554_v41 = vld [vmem:[#allocation4 + $0x140] ss:$8 sps:$4 sm:$0xff]  }
 0x6bd   : > { %2482 = vmatprep.subr.bf16.mxu0 %v4511_v11  ;;  %2527 = vmatprep.subr.bf16.mxu1 %v4511_v11  ;;  %v4559_v11 = vld [vmem:[#allocation4 + $0x154] ss:$8 sps:$4 sm:$0xff]  }
 0x6c0   : > { %2483 = vmatpush1.bf16.msra.mxu0 %v4509_v16  ;;  %2528 = vmatpush1.bf16.msra.mxu1 %v4509_v16  ;;  %v4557_v16 = vld [vmem:[#allocation4 + $0x150] ss:$8 sps:$4 sm:$0xff]  }
 0x6c1   : > { %2484 = vmatprep.subr.bf16.mxu0 %v4514_v24  ;;  %2529 = vmatprep.subr.bf16.mxu1 %v4514_v24  ;;  %v4562_v24 = vld [vmem:[#allocation4 + $0x164] ss:$8 sps:$4 sm:$0xff]  }
 0x6c4   : > { %2485 = vmatpush1.bf16.msra.mxu0 %v4512_v60  ;;  %2530 = vmatpush1.bf16.msra.mxu1 %v4512_v60  ;;  %v4560_v60 = vld [vmem:[#allocation4 + $0x160] ss:$8 sps:$4 sm:$0xff]  }
 0x6c5   : > { %2486 = vmatprep.subr.bf16.mxu0 %v4517_v4  ;;  %2531 = vmatprep.subr.bf16.mxu1 %v4517_v4  ;;  %v4565_v4 = vld [vmem:[#allocation4 + $0x174] ss:$8 sps:$4 sm:$0xff]  }
 0x6c8   : > { %2487 = vmatpush1.bf16.msra.mxu0 %v4515_v63  ;;  %2532 = vmatpush1.bf16.msra.mxu1 %v4515_v63  ;;  %v4563_v63 = vld [vmem:[#allocation4 + $0x170] ss:$8 sps:$4 sm:$0xff]  }
 0x6c9   : > { %2488 = vmatprep.subr.bf16.mxu0 %v4520_v49  ;;  %2533 = vmatprep.subr.bf16.mxu1 %v4520_v49  ;;  %v4568_v49 = vld [vmem:[#allocation4 + $0x184] ss:$8 sps:$4 sm:$0xff]  }
 0x6cc   : > { %2489 = vmatpush1.bf16.msra.mxu0 %v4518_v0  ;;  %2534 = vmatpush1.bf16.msra.mxu1 %v4518_v0  ;;  %v4566_v0 = vld [vmem:[#allocation4 + $0x180] ss:$8 sps:$4 sm:$0xff]  }
 0x6cd   : > { %2490 = vmatprep.subr.bf16.mxu0 %v4523_v58  ;;  %2535 = vmatprep.subr.bf16.mxu1 %v4523_v58  ;;  %v4571_v58 = vld [vmem:[#allocation4 + $0x194] ss:$8 sps:$4 sm:$0xff]  }
 0x6d0   : > { %2491 = vmatpush1.bf16.msra.mxu0 %v4521_v3  ;;  %2536 = vmatpush1.bf16.msra.mxu1 %v4521_v3  ;;  %v4569_v3 = vld [vmem:[#allocation4 + $0x190] ss:$8 sps:$4 sm:$0xff]  }
 0x6d1   : > { %2492 = vmatprep.subr.bf16.mxu0 %v4526_v5  ;;  %2537 = vmatprep.subr.bf16.mxu1 %v4526_v5  ;;  %v4574_v5 = vld [vmem:[#allocation4 + $0x1a4] ss:$8 sps:$4 sm:$0xff]  }
 0x6d4   : > { %2493 = vmatpush1.bf16.msra.mxu0 %v4524_v43  ;;  %2538 = vmatpush1.bf16.msra.mxu1 %v4524_v43  ;;  %v4572_v43 = vld [vmem:[#allocation4 + $0x1a0] ss:$8 sps:$4 sm:$0xff]  }
 0x6d5   : > { %2494 = vmatprep.subr.bf16.mxu0 %v4529_v13  ;;  %2539 = vmatprep.subr.bf16.mxu1 %v4529_v13  ;;  %v4577_v13 = vld [vmem:[#allocation4 + $0x1b4] ss:$8 sps:$4 sm:$0xff]  }
 0x6d8   : > { %2495 = vmatpush1.bf16.msra.mxu0 %v4527_v2  ;;  %2540 = vmatpush1.bf16.msra.mxu1 %v4527_v2  ;;  %v4575_v2 = vld [vmem:[#allocation4 + $0x1b0] ss:$8 sps:$4 sm:$0xff]  }
 0x6d9   : > { %2496 = vmatprep.subr.bf16.mxu0 %v4532_v50  ;;  %2541 = vmatprep.subr.bf16.mxu1 %v4532_v50  ;;  %v4580_v50 = vld [vmem:[#allocation4 + $0x1c4] ss:$8 sps:$4 sm:$0xff]  }
 0x6dc   : > { %2497 = vmatpush1.bf16.msra.mxu0 %v4530_v59  ;;  %2542 = vmatpush1.bf16.msra.mxu1 %v4530_v59  ;;  %v4578_v59 = vld [vmem:[#allocation4 + $0x1c0] ss:$8 sps:$4 sm:$0xff]  }
 0x6dd   : > { %2498 = vmatprep.subr.bf16.mxu0 %v4535_v17  ;;  %2543 = vmatprep.subr.bf16.mxu1 %v4535_v17  ;;  %v4583_v17 = vld [vmem:[#allocation4 + $0x1d4] ss:$8 sps:$4 sm:$0xff]  }
 0x6e0   : > { %2499 = vmatpush1.bf16.msra.mxu0 %v4533_v37  ;;  %2544 = vmatpush1.bf16.msra.mxu1 %v4533_v37  ;;  %v4581_v37 = vld [vmem:[#allocation4 + $0x1d0] ss:$8 sps:$4 sm:$0xff]  }
 0x6e1   : > { %2500 = vmatprep.subr.bf16.mxu0 %v4538_v40  ;;  %2545 = vmatprep.subr.bf16.mxu1 %v4538_v40  ;;  %v4586_v40 = vld [vmem:[#allocation4 + $0x1e4] ss:$8 sps:$4 sm:$0xff]  }
 0x6e4   : > { %2501 = vmatpush1.bf16.msra.mxu0 %v4536_v10  ;;  %2546 = vmatpush1.bf16.msra.mxu1 %v4536_v10  ;;  %v4584_v10 = vld [vmem:[#allocation4 + $0x1e0] ss:$8 sps:$4 sm:$0xff]  }
 0x6e5   : > { %2502 = vmatprep.subr.bf16.mxu0 %v4541_v20  ;;  %2547 = vmatprep.subr.bf16.mxu1 %v4541_v20  ;;  %v4589_v20 = vld [vmem:[#allocation4 + $0x1f4] ss:$8 sps:$4 sm:$0xff]  }
 0x6e8   : > { %2503 = vmatpush1.bf16.msra.mxu0 %v4539_v18  ;;  %2548 = vmatpush1.bf16.msra.mxu1 %v4539_v18  ;;  %v4587_v18 = vld [vmem:[#allocation4 + $0x1f0] ss:$8 sps:$4 sm:$0xff]  }
 0x6e9   : > { %2768 = vmatprep.subr.bf16.mxu0 %v4544_v56  ;;  %2813 = vmatprep.subr.bf16.mxu1 %v4544_v56  ;;  %v4592_v56 = vld [vmem:[#allocation4 + $0x204] ss:$8 sps:$4 sm:$0xff]  }
 0x77e   : > { %v2214_v35 = vpop.f32.mrb[8].mxu0  ;;  %v2255_v8 = vpop.f32.mrb[8].mxu1 }
 0x77f   : > { %v2215_v27 = vadd.f32 %v2214_v35, %v1876_v1  ;;  %v2256_v42 = vadd.f32 %v2255_v8, %v1884_v28  ;;  %v2216_v44 = vpop.f32.mrb[9].mxu0  ;;  %v2257_v31 = vpop.f32.mrb[9].mxu1 }
 0x780   : > { %v2217_v29 = vadd.f32 %v2216_v44, %v1880_v32  ;;  %v2258_v45 = vadd.f32 %v2257_v31, %v1888_v14  ;;  %v2218_v23 = vpop.f32.mrb[10].mxu0  ;;  %v2259_v46 = vpop.f32.mrb[10].mxu1 }
 0x781   : > { %v2262_v47 = vmax.f32 %v2215_v27, 0.0  ;;  %v2264_v51 = vmax.f32 %v2256_v42, 0.0  ;;  %v2219_v48 = vpop.f32.mrb[11].mxu0  ;;  %v2260_v53 = vpop.f32.mrb[11].mxu1 }
 0x782   : > { %v2263_v33 = vmax.f32 %v2217_v29, 0.0  ;;  %v2265_v15 = vmax.f32 %v2258_v45, 0.0  ;;  %v4590_v48 = vld [vmem:[#allocation4 + $0x200] ss:$8 sps:$4 sm:$0xff]  }
 0x783   : > { %v2299_v55 = vpack.c.bf16 %v2262_v47, %v2262_v47  ;;  %v2515_v62 = vpack.c.bf16 %v2264_v51, %v2264_v51 }
 0x784   : > { %v2300_v22 = vpack.c.bf16 %v2263_v33, %v2263_v33  ;;  %v2516_v54 = vpack.c.bf16 %v2265_v15, %v2265_v15  ;;  %v4595_v15 = vld [vmem:[#allocation4 + $0x214] ss:$8 sps:$4 sm:$0xff]  }
 0x786   : > { %2504 = vmatprep.mubr.bf16.mxu0 %v2300_v22  ;;  %2549 = vmatprep.mubr.bf16.mxu1 %v2516_v54  ;;  %v4593_v22 = vld [vmem:[#allocation4 + $0x210] ss:$8 sps:$4 sm:$0xff]   ;;  %v4598_v54 = vld [vmem:[#allocation4 + $0x224] ss:$8 sps:$4 sm:$0xff]  }
 0x787   : > { %2505 = vmatmul.mubr.bf16.vlgmr.msra.gmra.mrb[12].mxu0 %v2299_v55  ;;  %2550 = vmatmul.mubr.bf16.vlgmr.msra.gmra.mrb[12].mxu1 %v2515_v62  ;;  %v4601_v55 = vld [vmem:[#allocation4 + $0x234] ss:$8 sps:$4 sm:$0xff]   ;;  %v4599_v62 = vld [vmem:[#allocation4 + $0x230] ss:$8 sps:$4 sm:$0xff]  }
 0x788   : > { %2769 = vmatpush1.bf16.msra.mxu0 %v4542_v36  ;;  %2814 = vmatpush1.bf16.msra.mxu1 %v4542_v36  ;;  %v4596_v36 = vld [vmem:[#allocation4 + $0x220] ss:$8 sps:$4 sm:$0xff]  }
 0x789   : > { %2770 = vmatprep.subr.bf16.mxu0 %v4547_v39  ;;  %2815 = vmatprep.subr.bf16.mxu1 %v4547_v39  ;;  %v4604_v39 = vld [vmem:[#allocation4 + $0x244] ss:$8 sps:$4 sm:$0xff]  }
 0x78c   : > { %2771 = vmatpush1.bf16.msra.mxu0 %v4545_v57  ;;  %2816 = vmatpush1.bf16.msra.mxu1 %v4545_v57  ;;  %v4602_v57 = vld [vmem:[#allocation4 + $0x240] ss:$8 sps:$4 sm:$0xff]  }
 0x78d   : > { %2772 = vmatprep.subr.bf16.mxu0 %v4550_v7  ;;  %2817 = vmatprep.subr.bf16.mxu1 %v4550_v7  ;;  %v4607_v7 = vld [vmem:[#allocation4 + $0x254] ss:$8 sps:$4 sm:$0xff]  }
 0x790   : > { %2773 = vmatpush1.bf16.msra.mxu0 %v4548_v61  ;;  %2818 = vmatpush1.bf16.msra.mxu1 %v4548_v61  ;;  %v4605_v61 = vld [vmem:[#allocation4 + $0x250] ss:$8 sps:$4 sm:$0xff]  }
 0x791   : > { %2774 = vmatprep.subr.bf16.mxu0 %v4553_v9  ;;  %2819 = vmatprep.subr.bf16.mxu1 %v4553_v9  ;;  %v4610_v9 = vld [vmem:[#allocation4 + $0x264] ss:$8 sps:$4 sm:$0xff]  }
 0x794   : > { %2775 = vmatpush1.bf16.msra.mxu0 %v4551_v25  ;;  %2820 = vmatpush1.bf16.msra.mxu1 %v4551_v25  ;;  %v4608_v25 = vld [vmem:[#allocation4 + $0x260] ss:$8 sps:$4 sm:$0xff]  }
 0x795   : > { %2776 = vmatprep.subr.bf16.mxu0 %v4556_v30  ;;  %2821 = vmatprep.subr.bf16.mxu1 %v4556_v30  ;;  %v4613_v30 = vld [vmem:[#allocation4 + $0x274] ss:$8 sps:$4 sm:$0xff]  }
 0x798   : > { %2777 = vmatpush1.bf16.msra.mxu0 %v4554_v41  ;;  %2822 = vmatpush1.bf16.msra.mxu1 %v4554_v41  ;;  %v4611_v41 = vld [vmem:[#allocation4 + $0x270] ss:$8 sps:$4 sm:$0xff]  }
 0x799   : > { %2778 = vmatprep.subr.bf16.mxu0 %v4559_v11  ;;  %2823 = vmatprep.subr.bf16.mxu1 %v4559_v11  ;;  %v4616_v11 = vld [vmem:[#allocation4 + $0x284] ss:$8 sps:$4 sm:$0xff]  }
 0x79c   : > { %2779 = vmatpush1.bf16.msra.mxu0 %v4557_v16  ;;  %2824 = vmatpush1.bf16.msra.mxu1 %v4557_v16  ;;  %v4614_v16 = vld [vmem:[#allocation4 + $0x280] ss:$8 sps:$4 sm:$0xff]  }
 0x79d   : > { %2780 = vmatprep.subr.bf16.mxu0 %v4562_v24  ;;  %2825 = vmatprep.subr.bf16.mxu1 %v4562_v24  ;;  %v4619_v24 = vld [vmem:[#allocation4 + $0x294] ss:$8 sps:$4 sm:$0xff]  }
 0x7a0   : > { %2781 = vmatpush1.bf16.msra.mxu0 %v4560_v60  ;;  %2826 = vmatpush1.bf16.msra.mxu1 %v4560_v60  ;;  %v4617_v60 = vld [vmem:[#allocation4 + $0x290] ss:$8 sps:$4 sm:$0xff]  }
 0x7a1   : > { %2782 = vmatprep.subr.bf16.mxu0 %v4565_v4  ;;  %2827 = vmatprep.subr.bf16.mxu1 %v4565_v4  ;;  %v4622_v4 = vld [vmem:[#allocation4 + $0x2a4] ss:$8 sps:$4 sm:$0xff]  }
 0x7a4   : > { %2783 = vmatpush1.bf16.msra.mxu0 %v4563_v63  ;;  %2828 = vmatpush1.bf16.msra.mxu1 %v4563_v63  ;;  %v4620_v63 = vld [vmem:[#allocation4 + $0x2a0] ss:$8 sps:$4 sm:$0xff]  }
 0x7a5   : > { %2784 = vmatprep.subr.bf16.mxu0 %v4568_v49  ;;  %2829 = vmatprep.subr.bf16.mxu1 %v4568_v49  ;;  %v4625_v49 = vld [vmem:[#allocation4 + $0x2b4] ss:$8 sps:$4 sm:$0xff]  }
 0x7a8   : > { %2785 = vmatpush1.bf16.msra.mxu0 %v4566_v0  ;;  %2830 = vmatpush1.bf16.msra.mxu1 %v4566_v0  ;;  %v4623_v0 = vld [vmem:[#allocation4 + $0x2b0] ss:$8 sps:$4 sm:$0xff]  }
 0x7a9   : > { %2786 = vmatprep.subr.bf16.mxu0 %v4571_v58  ;;  %2831 = vmatprep.subr.bf16.mxu1 %v4571_v58  ;;  %v4628_v58 = vld [vmem:[#allocation4 + $0x2c4] ss:$8 sps:$4 sm:$0xff]  }
 0x7ac   : > { %2787 = vmatpush1.bf16.msra.mxu0 %v4569_v3  ;;  %2832 = vmatpush1.bf16.msra.mxu1 %v4569_v3  ;;  %v4626_v3 = vld [vmem:[#allocation4 + $0x2c0] ss:$8 sps:$4 sm:$0xff]  }
 0x7ad   : > { %2788 = vmatprep.subr.bf16.mxu0 %v4574_v5  ;;  %2833 = vmatprep.subr.bf16.mxu1 %v4574_v5  ;;  %v4631_v5 = vld [vmem:[#allocation4 + $0x2d4] ss:$8 sps:$4 sm:$0xff]  }
 0x7b0   : > { %2789 = vmatpush1.bf16.msra.mxu0 %v4572_v43  ;;  %2834 = vmatpush1.bf16.msra.mxu1 %v4572_v43  ;;  %v4629_v43 = vld [vmem:[#allocation4 + $0x2d0] ss:$8 sps:$4 sm:$0xff]  }
 0x7b1   : > { %2790 = vmatprep.subr.bf16.mxu0 %v4577_v13  ;;  %2835 = vmatprep.subr.bf16.mxu1 %v4577_v13  ;;  %v4632_v13 = vld [vmem:[#allocation4 + $0x2e0] ss:$8 sps:$4 sm:$0xff]  }
 0x7b4   : > { %2791 = vmatpush1.bf16.msra.mxu0 %v4575_v2  ;;  %2836 = vmatpush1.bf16.msra.mxu1 %v4575_v2  ;;  %v4634_v2 = vld [vmem:[#allocation4 + $0x2e4] ss:$8 sps:$4 sm:$0xff]  }
 0x7b5   : > { %2792 = vmatprep.subr.bf16.mxu0 %v4580_v50  ;;  %2837 = vmatprep.subr.bf16.mxu1 %v4580_v50  ;;  %v4637_v50 = vld [vmem:[#allocation4 + $0x2f4] ss:$8 sps:$4 sm:$0xff]  }
 0x7b8   : > { %2793 = vmatpush1.bf16.msra.mxu0 %v4578_v59  ;;  %2838 = vmatpush1.bf16.msra.mxu1 %v4578_v59  ;;  %v4635_v59 = vld [vmem:[#allocation4 + $0x2f0] ss:$8 sps:$4 sm:$0xff]  }
 0x7b9   : > { %2794 = vmatprep.subr.bf16.mxu0 %v4583_v17  ;;  %2839 = vmatprep.subr.bf16.mxu1 %v4583_v17  ;;  %v4640_v17 = vld [vmem:[#allocation4 + $0x304] ss:$8 sps:$4 sm:$0xff]  }
 0x7bc   : > { %2795 = vmatpush1.bf16.msra.mxu0 %v4581_v37  ;;  %2840 = vmatpush1.bf16.msra.mxu1 %v4581_v37  ;;  %v4083_v37 = vld [vmem:[%s5625_s13 + $0x2] sm:$0x3] }
 0x7bd   : > { %2796 = vmatprep.subr.bf16.mxu0 %v4586_v40  ;;  %2841 = vmatprep.subr.bf16.mxu1 %v4586_v40  ;;  %v2605_v40 = vrot.slane %v4083_v37, %v5480_v6 }
 0x7c0   : > { %2797 = vmatpush1.bf16.msra.mxu0 %v4584_v10  ;;  %2842 = vmatpush1.bf16.msra.mxu1 %v4584_v10  ;;  %v2601_v10 = vrot.slane %v4083_v37, %v5475_v21 }
 0x7c1   : > { %2798 = vmatprep.subr.bf16.mxu0 %v4589_v20  ;;  %2843 = vmatprep.subr.bf16.mxu1 %v4589_v20 }
 0x7c4   : > { %2799 = vmatpush1.bf16.msra.mxu0 %v4587_v18  ;;  %2844 = vmatpush1.bf16.msra.mxu1 %v4587_v18 }
 0x7c5   : > { %3064 = vmatprep.subr.bf16.mxu0 %v4592_v56  ;;  %3109 = vmatprep.subr.bf16.mxu1 %v4592_v56 }
 0x85a   : > { %v2506_v26 = vpop.f32.mrb[12].mxu0  ;;  %v2551_v12 = vpop.f32.mrb[12].mxu1 }
 0x85b   : > { %v2507_v1 = vadd.f32 %v2506_v26, %v2305_v34  ;;  %v2552_v28 = vadd.f32 %v2551_v12, %v2305_v34  ;;  %v2508_v32 = vpop.f32.mrb[13].mxu0  ;;  %v2553_v14 = vpop.f32.mrb[13].mxu1 }
 0x85c   : > { %v2509_v35 = vadd.f32 %v2508_v32, %v2309_v52  ;;  %v2554_v8 = vadd.f32 %v2553_v14, %v2309_v52  ;;  %v2510_v27 = vpop.f32.mrb[14].mxu0  ;;  %v2555_v42 = vpop.f32.mrb[14].mxu1 }
 0x85d   : > { %v2513_v44 = vmax.f32 %v2507_v1, 0.0  ;;  %v2558_v31 = vmax.f32 %v2552_v28, 0.0  ;;  %v2511_v29 = vpop.f32.mrb[15].mxu0  ;;  %v2556_v45 = vpop.f32.mrb[15].mxu1 }
 0x85e   : > { %v2514_v23 = vmax.f32 %v2509_v35, 0.0  ;;  %v2559_v46 = vmax.f32 %v2554_v8, 0.0  ;;  %v4638_v29 = vld [vmem:[#allocation4 + $0x300] ss:$8 sps:$4 sm:$0xff]  }
 0x85f   : > { %v2595_v53 = vpack.c.bf16 %v2513_v44, %v2513_v44  ;;  %v2811_v33 = vpack.c.bf16 %v2558_v31, %v2558_v31 }
 0x860   : > { %v2596_v47 = vpack.c.bf16 %v2514_v23, %v2514_v23  ;;  %v2812_v51 = vpack.c.bf16 %v2559_v46, %v2559_v46  ;;  %v4643_v46 = vld [vmem:[#allocation4 + $0x314] ss:$8 sps:$4 sm:$0xff]  }
 0x862   : > { %2800 = vmatprep.mubr.bf16.mxu0 %v2596_v47  ;;  %2845 = vmatprep.mubr.bf16.mxu1 %v2812_v51  ;;  %v4641_v47 = vld [vmem:[#allocation4 + $0x310] ss:$8 sps:$4 sm:$0xff]   ;;  %v4646_v51 = vld [vmem:[#allocation4 + $0x324] ss:$8 sps:$4 sm:$0xff]  }
 0x863   : > { %2801 = vmatmul.mubr.bf16.vlgmr.msra.gmra.mrb[16].mxu0 %v2595_v53  ;;  %2846 = vmatmul.mubr.bf16.vlgmr.msra.gmra.mrb[16].mxu1 %v2811_v33  ;;  %v4649_v53 = vld [vmem:[#allocation4 + $0x334] ss:$8 sps:$4 sm:$0xff]   ;;  %v4647_v33 = vld [vmem:[#allocation4 + $0x330] ss:$8 sps:$4 sm:$0xff]  }
 0x864   : > { %3065 = vmatpush1.bf16.msra.mxu0 %v4590_v48  ;;  %3110 = vmatpush1.bf16.msra.mxu1 %v4590_v48  ;;  %v4644_v48 = vld [vmem:[#allocation4 + $0x320] ss:$8 sps:$4 sm:$0xff]  }
 0x865   : > { %3066 = vmatprep.subr.bf16.mxu0 %v4595_v15  ;;  %3111 = vmatprep.subr.bf16.mxu1 %v4595_v15  ;;  %v4652_v15 = vld [vmem:[#allocation4 + $0x344] ss:$8 sps:$4 sm:$0xff]  }
 0x868   : > { %3067 = vmatpush1.bf16.msra.mxu0 %v4593_v22  ;;  %3112 = vmatpush1.bf16.msra.mxu1 %v4593_v22  ;;  %v4650_v22 = vld [vmem:[#allocation4 + $0x340] ss:$8 sps:$4 sm:$0xff]  }
 0x869   : > { %3068 = vmatprep.subr.bf16.mxu0 %v4598_v54  ;;  %3113 = vmatprep.subr.bf16.mxu1 %v4598_v54  ;;  %v4655_v54 = vld [vmem:[#allocation4 + $0x354] ss:$8 sps:$4 sm:$0xff]  }
 0x86c   : > { %3069 = vmatpush1.bf16.msra.mxu0 %v4596_v36  ;;  %3114 = vmatpush1.bf16.msra.mxu1 %v4596_v36  ;;  %v4653_v36 = vld [vmem:[#allocation4 + $0x350] ss:$8 sps:$4 sm:$0xff]  }
 0x86d   : > { %3070 = vmatprep.subr.bf16.mxu0 %v4601_v55  ;;  %3115 = vmatprep.subr.bf16.mxu1 %v4601_v55  ;;  %v4658_v55 = vld [vmem:[#allocation4 + $0x364] ss:$8 sps:$4 sm:$0xff]  }
 0x870   : > { %3071 = vmatpush1.bf16.msra.mxu0 %v4599_v62  ;;  %3116 = vmatpush1.bf16.msra.mxu1 %v4599_v62  ;;  %v4656_v62 = vld [vmem:[#allocation4 + $0x360] ss:$8 sps:$4 sm:$0xff]  }
 0x871   : > { %3072 = vmatprep.subr.bf16.mxu0 %v4604_v39  ;;  %3117 = vmatprep.subr.bf16.mxu1 %v4604_v39  ;;  %v4661_v39 = vld [vmem:[#allocation4 + $0x374] ss:$8 sps:$4 sm:$0xff]  }
 0x874   : > { %3073 = vmatpush1.bf16.msra.mxu0 %v4602_v57  ;;  %3118 = vmatpush1.bf16.msra.mxu1 %v4602_v57  ;;  %v4659_v57 = vld [vmem:[#allocation4 + $0x370] ss:$8 sps:$4 sm:$0xff]  }
 0x875   : > { %3074 = vmatprep.subr.bf16.mxu0 %v4607_v7  ;;  %3119 = vmatprep.subr.bf16.mxu1 %v4607_v7  ;;  %v4664_v7 = vld [vmem:[#allocation4 + $0x384] ss:$8 sps:$4 sm:$0xff]  }
 0x878   : > { %3075 = vmatpush1.bf16.msra.mxu0 %v4605_v61  ;;  %3120 = vmatpush1.bf16.msra.mxu1 %v4605_v61  ;;  %v4662_v61 = vld [vmem:[#allocation4 + $0x380] ss:$8 sps:$4 sm:$0xff]  }
 0x879   : > { %3076 = vmatprep.subr.bf16.mxu0 %v4610_v9  ;;  %3121 = vmatprep.subr.bf16.mxu1 %v4610_v9  ;;  %v4667_v9 = vld [vmem:[#allocation4 + $0x394] ss:$8 sps:$4 sm:$0xff]  }
 0x87c   : > { %3077 = vmatpush1.bf16.msra.mxu0 %v4608_v25  ;;  %3122 = vmatpush1.bf16.msra.mxu1 %v4608_v25  ;;  %v4665_v25 = vld [vmem:[#allocation4 + $0x390] ss:$8 sps:$4 sm:$0xff]  }
 0x87d   : > { %3078 = vmatprep.subr.bf16.mxu0 %v4613_v30  ;;  %3123 = vmatprep.subr.bf16.mxu1 %v4613_v30  ;;  %v4670_v30 = vld [vmem:[#allocation4 + $0x3a4] ss:$8 sps:$4 sm:$0xff]  }
 0x880   : > { %3079 = vmatpush1.bf16.msra.mxu0 %v4611_v41  ;;  %3124 = vmatpush1.bf16.msra.mxu1 %v4611_v41  ;;  %v4668_v41 = vld [vmem:[#allocation4 + $0x3a0] ss:$8 sps:$4 sm:$0xff]  }
 0x881   : > { %3080 = vmatprep.subr.bf16.mxu0 %v4616_v11  ;;  %3125 = vmatprep.subr.bf16.mxu1 %v4616_v11  ;;  %v4673_v11 = vld [vmem:[#allocation4 + $0x3b4] ss:$8 sps:$4 sm:$0xff]  }
 0x884   : > { %3081 = vmatpush1.bf16.msra.mxu0 %v4614_v16  ;;  %3126 = vmatpush1.bf16.msra.mxu1 %v4614_v16  ;;  %v4671_v16 = vld [vmem:[#allocation4 + $0x3b0] ss:$8 sps:$4 sm:$0xff]  }
 0x885   : > { %3082 = vmatprep.subr.bf16.mxu0 %v4619_v24  ;;  %3127 = vmatprep.subr.bf16.mxu1 %v4619_v24  ;;  %v4676_v24 = vld [vmem:[#allocation4 + $0x3c4] ss:$8 sps:$4 sm:$0xff]  }
 0x888   : > { %3083 = vmatpush1.bf16.msra.mxu0 %v4617_v60  ;;  %3128 = vmatpush1.bf16.msra.mxu1 %v4617_v60  ;;  %v4674_v60 = vld [vmem:[#allocation4 + $0x3c0] ss:$8 sps:$4 sm:$0xff]  }
 0x889   : > { %3084 = vmatprep.subr.bf16.mxu0 %v4622_v4  ;;  %3129 = vmatprep.subr.bf16.mxu1 %v4622_v4  ;;  %v4679_v4 = vld [vmem:[#allocation4 + $0x3d4] ss:$8 sps:$4 sm:$0xff]  }
 0x88c   : > { %3085 = vmatpush1.bf16.msra.mxu0 %v4620_v63  ;;  %3130 = vmatpush1.bf16.msra.mxu1 %v4620_v63  ;;  %v4677_v63 = vld [vmem:[#allocation4 + $0x3d0] ss:$8 sps:$4 sm:$0xff]  }
 0x88d   : > { %3086 = vmatprep.subr.bf16.mxu0 %v4625_v49  ;;  %3131 = vmatprep.subr.bf16.mxu1 %v4625_v49  ;;  %v4680_v49 = vld [vmem:[#allocation4 + $0x3e0] ss:$8 sps:$4 sm:$0xff]  }
 0x890   : > { %3087 = vmatpush1.bf16.msra.mxu0 %v4623_v0  ;;  %3132 = vmatpush1.bf16.msra.mxu1 %v4623_v0  ;;  %v4682_v0 = vld [vmem:[#allocation4 + $0x3e4] ss:$8 sps:$4 sm:$0xff]  }
 0x891   : > { %3088 = vmatprep.subr.bf16.mxu0 %v4628_v58  ;;  %3133 = vmatprep.subr.bf16.mxu1 %v4628_v58  ;;  %v4685_v58 = vld [vmem:[#allocation4 + $0x3f4] ss:$8 sps:$4 sm:$0xff]  }
 0x894   : > { %3089 = vmatpush1.bf16.msra.mxu0 %v4626_v3  ;;  %3134 = vmatpush1.bf16.msra.mxu1 %v4626_v3  ;;  %v4683_v3 = vld [vmem:[#allocation4 + $0x3f0] ss:$8 sps:$4 sm:$0xff]  }
 0x895   : > { %3090 = vmatprep.subr.bf16.mxu0 %v4631_v5  ;;  %3135 = vmatprep.subr.bf16.mxu1 %v4631_v5  ;;  %v4686_v5 = vld [vmem:[%s5626_s14 + $0x40] sm:$0xff]  }
 0x898   : > { %3091 = vmatpush1.bf16.msra.mxu0 %v4629_v43  ;;  %3136 = vmatpush1.bf16.msra.mxu1 %v4629_v43  ;;  %v4687_v43 = vld [vmem:[%s5626_s14 + $0xc0] sm:$0xff]  }
 0x899   : > { %3092 = vmatprep.subr.bf16.mxu0 %v4634_v2  ;;  %3137 = vmatprep.subr.bf16.mxu1 %v4634_v2 }
 0x89c   : > { %3093 = vmatpush1.bf16.msra.mxu0 %v4632_v13  ;;  %3138 = vmatpush1.bf16.msra.mxu1 %v4632_v13  ;;  %v4116_v13 = vld [vmem:[%s5625_s13 + $0x4] sm:$0x3] }
 0x89d   : > { %3094 = vmatprep.subr.bf16.mxu0 %v4637_v50  ;;  %3139 = vmatprep.subr.bf16.mxu1 %v4637_v50  ;;  %v2897_v2 = vrot.slane %v4116_v13, %v5475_v21  ;;  %v2901_v50 = vrot.slane %v4116_v13, %v5480_v6 }
 0x8a0   : > { %3095 = vmatpush1.bf16.msra.mxu0 %v4635_v59  ;;  %3140 = vmatpush1.bf16.msra.mxu1 %v4635_v59 }
 0x8a1   : > { %3360 = vmatprep.subr.bf16.mxu0 %v4640_v17  ;;  %3405 = vmatprep.subr.bf16.mxu1 %v4640_v17 }
 0x936   : > { %v2802_v20 = vpop.f32.mrb[16].mxu0  ;;  %v2847_v18 = vpop.f32.mrb[16].mxu1 }
 0x937   : > { %v2803_v56 = vadd.f32 %v2802_v20, %v2601_v10  ;;  %v2848_v19 = vadd.f32 %v2847_v18, %v2601_v10  ;;  %v2804_v34 = vpop.f32.mrb[17].mxu0  ;;  %v2849_v52 = vpop.f32.mrb[17].mxu1 }
 0x938   : > { %v2805_v26 = vadd.f32 %v2804_v34, %v2605_v40  ;;  %v2850_v12 = vadd.f32 %v2849_v52, %v2605_v40  ;;  %v2806_v1 = vpop.f32.mrb[18].mxu0  ;;  %v2851_v28 = vpop.f32.mrb[18].mxu1 }
 0x939   : > { %v2809_v32 = vmax.f32 %v2803_v56, 0.0  ;;  %v2854_v14 = vmax.f32 %v2848_v19, 0.0  ;;  %v2807_v35 = vpop.f32.mrb[19].mxu0  ;;  %v2852_v8 = vpop.f32.mrb[19].mxu1 }
 0x93a   : > { %v2810_v27 = vmax.f32 %v2805_v26, 0.0  ;;  %v2855_v42 = vmax.f32 %v2850_v12, 0.0  ;;  %v4688_v8 = vld [vmem:[%s5626_s14] sm:$0xff]  }
 0x93b   : > { %v2891_v45 = vpack.c.bf16 %v2809_v32, %v2809_v32  ;;  %v3107_v23 = vpack.c.bf16 %v2854_v14, %v2854_v14 }
 0x93c   : > { %v2892_v44 = vpack.c.bf16 %v2810_v27, %v2810_v27  ;;  %v3108_v31 = vpack.c.bf16 %v2855_v42, %v2855_v42  ;;  %v4689_v27 = vld [vmem:[%s5626_s14 + $0x80] sm:$0xff]  }
 0x93e   : > { %3096 = vmatprep.mubr.bf16.mxu0 %v2892_v44  ;;  %3141 = vmatprep.mubr.bf16.mxu1 %v3108_v31  ;;  %v4690_v31 = vld [vmem:[%s5626_s14 + $0x48] sm:$0xff]  }
 0x93f   : > { %3097 = vmatmul.mubr.bf16.vlgmr.msra.gmra.mrb[20].mxu0 %v2891_v45  ;;  %3142 = vmatmul.mubr.bf16.vlgmr.msra.gmra.mrb[20].mxu1 %v3107_v23  ;;  %v4692_v45 = vld [vmem:[%s5626_s14 + $0x8] sm:$0xff]  }
 0x940   : > { %3361 = vmatpush1.bf16.msra.mxu0 %v4638_v29  ;;  %3406 = vmatpush1.bf16.msra.mxu1 %v4638_v29  ;;  %v4691_v29 = vld [vmem:[%s5626_s14 + $0xc8] sm:$0xff]  }
 0x941   : > { %3362 = vmatprep.subr.bf16.mxu0 %v4643_v46  ;;  %3407 = vmatprep.subr.bf16.mxu1 %v4643_v46  ;;  %v4693_v23 = vld [vmem:[%s5626_s14 + $0x88] sm:$0xff]   ;;  %v4694_v46 = vld [vmem:[%s5626_s14 + $0x50] sm:$0xff]  }
 0x944   : > { %3363 = vmatpush1.bf16.msra.mxu0 %v4641_v47  ;;  %3408 = vmatpush1.bf16.msra.mxu1 %v4641_v47  ;;  %v4695_v47 = vld [vmem:[%s5626_s14 + $0xd0] sm:$0xff]  }
 0x945   : > { %3364 = vmatprep.subr.bf16.mxu0 %v4646_v51  ;;  %3409 = vmatprep.subr.bf16.mxu1 %v4646_v51  ;;  %v4696_v51 = vld [vmem:[%s5626_s14 + $0x10] sm:$0xff]  }
 0x948   : > { %3365 = vmatpush1.bf16.msra.mxu0 %v4644_v48  ;;  %3410 = vmatpush1.bf16.msra.mxu1 %v4644_v48  ;;  %v4697_v48 = vld [vmem:[%s5626_s14 + $0x90] sm:$0xff]  }
 0x949   : > { %3366 = vmatprep.subr.bf16.mxu0 %v4649_v53  ;;  %3411 = vmatprep.subr.bf16.mxu1 %v4649_v53  ;;  %v4698_v53 = vld [vmem:[%s5626_s14 + $0x58] sm:$0xff]  }
 0x94c   : > { %3367 = vmatpush1.bf16.msra.mxu0 %v4647_v33  ;;  %3412 = vmatpush1.bf16.msra.mxu1 %v4647_v33  ;;  %v4699_v33 = vld [vmem:[%s5626_s14 + $0xd8] sm:$0xff]  }
 0x94d   : > { %3368 = vmatprep.subr.bf16.mxu0 %v4652_v15  ;;  %3413 = vmatprep.subr.bf16.mxu1 %v4652_v15  ;;  %v4700_v15 = vld [vmem:[%s5626_s14 + $0x18] sm:$0xff]  }
 0x950   : > { %3369 = vmatpush1.bf16.msra.mxu0 %v4650_v22  ;;  %3414 = vmatpush1.bf16.msra.mxu1 %v4650_v22  ;;  %v4701_v22 = vld [vmem:[%s5626_s14 + $0x98] sm:$0xff]  }
 0x951   : > { %3370 = vmatprep.subr.bf16.mxu0 %v4655_v54  ;;  %3415 = vmatprep.subr.bf16.mxu1 %v4655_v54  ;;  %v4702_v54 = vld [vmem:[%s5626_s14 + $0x60] sm:$0xff]  }
 0x954   : > { %3371 = vmatpush1.bf16.msra.mxu0 %v4653_v36  ;;  %3416 = vmatpush1.bf16.msra.mxu1 %v4653_v36  ;;  %v4703_v36 = vld [vmem:[%s5626_s14 + $0xe0] sm:$0xff]  }
 0x955   : > { %3372 = vmatprep.subr.bf16.mxu0 %v4658_v55  ;;  %3417 = vmatprep.subr.bf16.mxu1 %v4658_v55  ;;  %v4704_v55 = vld [vmem:[%s5626_s14 + $0x20] sm:$0xff]  }
 0x958   : > { %3373 = vmatpush1.bf16.msra.mxu0 %v4656_v62  ;;  %3418 = vmatpush1.bf16.msra.mxu1 %v4656_v62  ;;  %v4705_v62 = vld [vmem:[%s5626_s14 + $0xa0] sm:$0xff]  }
 0x959   : > { %3374 = vmatprep.subr.bf16.mxu0 %v4661_v39  ;;  %3419 = vmatprep.subr.bf16.mxu1 %v4661_v39  ;;  %v4706_v39 = vld [vmem:[%s5626_s14 + $0x68] sm:$0xff]  }
 0x95c   : > { %3375 = vmatpush1.bf16.msra.mxu0 %v4659_v57  ;;  %3420 = vmatpush1.bf16.msra.mxu1 %v4659_v57  ;;  %v4707_v57 = vld [vmem:[%s5626_s14 + $0xe8] sm:$0xff]  }
 0x95d   : > { %3376 = vmatprep.subr.bf16.mxu0 %v4664_v7  ;;  %3421 = vmatprep.subr.bf16.mxu1 %v4664_v7  ;;  %v4708_v7 = vld [vmem:[%s5626_s14 + $0x28] sm:$0xff]  }
 0x960   : > { %3377 = vmatpush1.bf16.msra.mxu0 %v4662_v61  ;;  %3422 = vmatpush1.bf16.msra.mxu1 %v4662_v61  ;;  %v4709_v61 = vld [vmem:[%s5626_s14 + $0xa8] sm:$0xff]  }
 0x961   : > { %3378 = vmatprep.subr.bf16.mxu0 %v4667_v9  ;;  %3423 = vmatprep.subr.bf16.mxu1 %v4667_v9  ;;  %v4710_v9 = vld [vmem:[%s5626_s14 + $0x70] sm:$0xff]  }
 0x964   : > { %3379 = vmatpush1.bf16.msra.mxu0 %v4665_v25  ;;  %3424 = vmatpush1.bf16.msra.mxu1 %v4665_v25  ;;  %v4711_v25 = vld [vmem:[%s5626_s14 + $0xf0] sm:$0xff]  }
 0x965   : > { %3380 = vmatprep.subr.bf16.mxu0 %v4670_v30  ;;  %3425 = vmatprep.subr.bf16.mxu1 %v4670_v30  ;;  %v4712_v30 = vld [vmem:[%s5626_s14 + $0x30] sm:$0xff]  }
 0x968   : > { %3381 = vmatpush1.bf16.msra.mxu0 %v4668_v41  ;;  %3426 = vmatpush1.bf16.msra.mxu1 %v4668_v41  ;;  %v4713_v41 = vld [vmem:[%s5626_s14 + $0xb0] sm:$0xff]  }
 0x969   : > { %3382 = vmatprep.subr.bf16.mxu0 %v4673_v11  ;;  %3427 = vmatprep.subr.bf16.mxu1 %v4673_v11  ;;  %v4714_v11 = vld [vmem:[%s5626_s14 + $0x78] sm:$0xff]  }
 0x96c   : > { %3383 = vmatpush1.bf16.msra.mxu0 %v4671_v16  ;;  %3428 = vmatpush1.bf16.msra.mxu1 %v4671_v16  ;;  %v4715_v16 = vld [vmem:[%s5626_s14 + $0xf8] sm:$0xff]  }
 0x96d   : > { %3384 = vmatprep.subr.bf16.mxu0 %v4676_v24  ;;  %3429 = vmatprep.subr.bf16.mxu1 %v4676_v24  ;;  %v4716_v24 = vld [vmem:[%s5626_s14 + $0x38] sm:$0xff]  }
 0x970   : > { %3385 = vmatpush1.bf16.msra.mxu0 %v4674_v60  ;;  %3430 = vmatpush1.bf16.msra.mxu1 %v4674_v60  ;;  %v4717_v60 = vld [vmem:[%s5626_s14 + $0xb8] sm:$0xff]  }
 0x971   : > { %3386 = vmatprep.subr.bf16.mxu0 %v4679_v4  ;;  %3431 = vmatprep.subr.bf16.mxu1 %v4679_v4  ;;  %v4149_v4 = vld [vmem:[%s5625_s13 + $0x6] sm:$0x3] }
 0x974   : > { %3387 = vmatpush1.bf16.msra.mxu0 %v4677_v63  ;;  %3432 = vmatpush1.bf16.msra.mxu1 %v4677_v63  ;;  %v3193_v63 = vrot.slane %v4149_v4, %v5475_v21 }
 0x975   : > { %3388 = vmatprep.subr.bf16.mxu0 %v4682_v0  ;;  %3433 = vmatprep.subr.bf16.mxu1 %v4682_v0 }
 0x978   : > { %3389 = vmatpush1.bf16.msra.mxu0 %v4680_v49  ;;  %3434 = vmatpush1.bf16.msra.mxu1 %v4680_v49  ;;  %v3197_v49 = vrot.slane %v4149_v4, %v5480_v6 }
 0x979   : > { %3390 = vmatprep.subr.bf16.mxu0 %v4685_v58  ;;  %3435 = vmatprep.subr.bf16.mxu1 %v4685_v58 }
 0x97c   : > { %3391 = vmatpush1.bf16.msra.mxu0 %v4683_v3  ;;  %3436 = vmatpush1.bf16.msra.mxu1 %v4683_v3 }
 0x97d   : > { %4260 = vmatprep.subr.bf16.mxu0 %v4686_v5  ;;  %4282 = vmatprep.subr.bf16.mxu1 %v4687_v43 }
 0xa12   : > { %v3098_v59 = vpop.f32.mrb[20].mxu0  ;;  %v3143_v17 = vpop.f32.mrb[20].mxu1 }
 0xa13   : > { %v3099_v37 = vadd.f32 %v3098_v59, %v2897_v2  ;;  %v3144_v10 = vadd.f32 %v3143_v17, %v2897_v2  ;;  %v3100_v40 = vpop.f32.mrb[21].mxu0  ;;  %v3145_v20 = vpop.f32.mrb[21].mxu1 }
 0xa14   : > { %v3101_v18 = vadd.f32 %v3100_v40, %v2901_v50  ;;  %v3146_v56 = vadd.f32 %v3145_v20, %v2901_v50  ;;  %v3102_v19 = vpop.f32.mrb[22].mxu0  ;;  %v3147_v34 = vpop.f32.mrb[22].mxu1 }
 0xa15   : > { %v3105_v52 = vmax.f32 %v3099_v37, 0.0  ;;  %v3150_v26 = vmax.f32 %v3144_v10, 0.0  ;;  %v3103_v12 = vpop.f32.mrb[23].mxu0  ;;  %v3148_v1 = vpop.f32.mrb[23].mxu1 }
 0xa16   : > { %v3106_v28 = vmax.f32 %v3101_v18, 0.0  ;;  %v3151_v32 = vmax.f32 %v3146_v56, 0.0  ;;  %v4198_v12 = vld [vmem:[%s5627_s15] ss:$0 sm:$0xff] }
 0xa17   : > { %v3187_v42 = vpack.c.bf16 %v3105_v52, %v3105_v52  ;;  %v3403_v44 = vpack.c.bf16 %v3150_v26, %v3150_v26 }
 0xa18   : > { %v3188_v14 = vpack.c.bf16 %v3106_v28, %v3106_v28  ;;  %v3404_v35 = vpack.c.bf16 %v3151_v32, %v3151_v32 }
 0xa1a   : > { %3392 = vmatprep.mubr.bf16.mxu0 %v3188_v14  ;;  %3437 = vmatprep.mubr.bf16.mxu1 %v3404_v35 }
 0xa1b   : > { %3393 = vmatmul.mubr.bf16.vlgmr.msra.gmra.mrb[24].mxu0 %v3187_v42  ;;  %3438 = vmatmul.mubr.bf16.vlgmr.msra.gmra.mrb[24].mxu1 %v3403_v44 }
 0xa1c   : > { %4261 = vmatpush3.bf16.msra.mxu0 %v4688_v8  ;;  %4283 = vmatpush3.bf16.msra.mxu1 %v4689_v27 }
 0xa1d   : > { %4262 = vmatprep.subr.bf16.mxu0 %v4690_v31  ;;  %4284 = vmatprep.subr.bf16.mxu1 %v4691_v29 }
 0xa20   : > { %4263 = vmatpush3.bf16.msra.mxu0 %v4692_v45  ;;  %4285 = vmatpush3.bf16.msra.mxu1 %v4693_v23 }
 0xa21   : > { %4264 = vmatprep.subr.bf16.mxu0 %v4694_v46  ;;  %4286 = vmatprep.subr.bf16.mxu1 %v4695_v47 }
 0xa24   : > { %4265 = vmatpush3.bf16.msra.mxu0 %v4696_v51  ;;  %4287 = vmatpush3.bf16.msra.mxu1 %v4697_v48 }
 0xa25   : > { %4266 = vmatprep.subr.bf16.mxu0 %v4698_v53  ;;  %4288 = vmatprep.subr.bf16.mxu1 %v4699_v33  ;;  %v872_v33 = vmax.f32 %v5062_v38, 0.0 }
 0xa28   : > { %4267 = vmatpush3.bf16.msra.mxu0 %v4700_v15  ;;  %4289 = vmatpush3.bf16.msra.mxu1 %v4701_v22 }
 0xa29   : > { %4268 = vmatprep.subr.bf16.mxu0 %v4702_v54  ;;  %4290 = vmatprep.subr.bf16.mxu1 %v4703_v36 }
 0xa2c   : > { %4269 = vmatpush3.bf16.msra.mxu0 %v4704_v55  ;;  %4291 = vmatpush3.bf16.msra.mxu1 %v4705_v62 }
 0xa2d   : > { %4270 = vmatprep.subr.bf16.mxu0 %v4706_v39  ;;  %4292 = vmatprep.subr.bf16.mxu1 %v4707_v57 }
 0xa30   : > { %4271 = vmatpush3.bf16.msra.mxu0 %v4708_v7  ;;  %4293 = vmatpush3.bf16.msra.mxu1 %v4709_v61 }
 0xa31   : > { %4272 = vmatprep.subr.bf16.mxu0 %v4710_v9  ;;  %4294 = vmatprep.subr.bf16.mxu1 %v4711_v25 }
 0xa34   : > { %4273 = vmatpush3.bf16.msra.mxu0 %v4712_v30  ;;  %4295 = vmatpush3.bf16.msra.mxu1 %v4713_v41 }
 0xa35   : > { %4274 = vmatprep.subr.bf16.mxu0 %v4714_v11  ;;  %4296 = vmatprep.subr.bf16.mxu1 %v4715_v16 }
 0xa38   : > { %4275 = vmatpush3.bf16.msra.mxu0 %v4716_v24  ;;  %4297 = vmatpush3.bf16.msra.mxu1 %v4717_v60 }
 0xaee   : > { %v3394_v0 = vpop.f32.mrb[24].mxu0  ;;  %v3439_v58 = vpop.f32.mrb[24].mxu1 }
 0xaef   : > { %v3395_v3 = vadd.f32 %v3394_v0, %v3193_v63  ;;  %v3440_v5 = vadd.f32 %v3439_v58, %v3193_v63  ;;  %v3396_v43 = vpop.f32.mrb[25].mxu0  ;;  %v3441_v13 = vpop.f32.mrb[25].mxu1 }
 0xaf0   : > { %v3397_v2 = vadd.f32 %v3396_v43, %v3197_v49  ;;  %v3442_v50 = vadd.f32 %v3441_v13, %v3197_v49  ;;  %v3398_v59 = vpop.f32.mrb[26].mxu0  ;;  %v3443_v17 = vpop.f32.mrb[26].mxu1 }
 0xaf1   : > { %v3401_v37 = vmax.f32 %v3395_v3, 0.0  ;;  %v3446_v10 = vmax.f32 %v3440_v5, 0.0  ;;  %v3399_v40 = vpop.f32.mrb[27].mxu0  ;;  %v3444_v20 = vpop.f32.mrb[27].mxu1 }
 0xaf2   : > { %v3402_v18 = vmax.f32 %v3397_v2, 0.0  ;;  %v3447_v56 = vmax.f32 %v3442_v50, 0.0 }
 0xaf3   : > { %v3481_v34 = vpack.c.bf16 %v3401_v37, %v3401_v37  ;;  %v3659_v6 = vpack.c.bf16 %v3446_v10, %v3446_v10 }
 0xaf4   : > { %v3482_v19 = vpack.c.bf16 %v3402_v18, %v3402_v18  ;;  %v3660_v21 = vpack.c.bf16 %v3447_v56, %v3447_v56 }
 0xaf6   : > { %3611 = vmatprep.mubr.bf16.mxu0 %v3482_v19  ;;  %3789 = vmatprep.mubr.bf16.mxu1 %v3660_v21 }
 0xaf7   : > { %3612 = vmatmul.mubr.bf16.vlgmr.msra.gmra.mrb[28].mxu0 %v3481_v34  ;;  %3790 = vmatmul.mubr.bf16.vlgmr.msra.gmra.mrb[28].mxu1 %v3659_v6 }
 0xbca   : > { %v4276_v52 = vpop.f32.mrb[28].mxu0  ;;  %v4298_v26 = vpop.f32.mrb[28].mxu1 }
 0xbcb   : > { %v4277_v1 = vpop.f32.mrb[29].mxu0  ;;  %v4299_v28 = vpop.f32.mrb[29].mxu1 }
 0xbcc   : > { %v4278_v32 = vadd.f32 %v4277_v1, %v4276_v52  ;;  %v4300_v14 = vadd.f32 %v4299_v28, %v4298_v26  ;;  %v4279_v35 = vpop.f32.mrb[30].mxu0  ;;  %v4301_v8 = vpop.f32.mrb[30].mxu1 }
 0xbcd   : > { %v4280_v27 = vpop.f32.mrb[31].mxu0  ;;  %v4302_v42 = vpop.f32.mrb[31].mxu1 }
 0xbce   : > { %v3625_v44 = vadd.f32 %v4278_v32, %v4198_v12 }
 0xbd0   : > { %v3797_v31 = vadd.f32 %v4300_v14, %v3625_v44 }
 0xbd2   : > { %v3799_v29 = vand.u32 2147483647, %v3797_v31  ;;  %v3798_v48 = vmax.f32 %v3797_v31, 0.0 }
 0xbd4   : > { %v3800_v45 = vsub.f32 0.0, %v3799_v29 }
 0xbd6   : > { %v3801_v23 = vmul.f32 1.442695, %v3800_v45 }
 0xbd8   : > { %4740 = vpow2.f32 %v3801_v23 }
 0xbe2   : > { %v4741_v46 = vpop.eup %4740 }
 0xbe3   : > { %v3803_v47 = vadd.f32 1.0, %v4741_v46 }
 0xbe5   : > { %4742 = vlog2.f32 %v3803_v47 }
 0xbef   : > { %v4743_v51 = vpop.eup %4742 }
 0xbf0   : > { %v3805_v53 = vmul.f32 0.6931472, %v4743_v51 }
 0xbf2   : > { %v3806_v15 = vadd.f32 %v3805_v53, %v3798_v48 }
 0xbf4   : > { %v3807_v22 = vmul.f32 %v3806_v15, %v872_v33 }
 0xbf6   : > { %v3808_v54 = vsel %vm921_vm4, %v3807_v22, 0.0 }
 0xbf7   : > { %3809 = vadd.xlane.f32.xlu0 %v3808_v54 }
 0xc84   : > { %v3810_v36 = vpop.xlane.xlu0 %3809 }
 0xc85   : > { %3812 = vst.msk [vmem:[%s601_s19] sm:$0xff] %vm3811_vm8, %v3810_v36 }
 0xc86 PF: > { %s5651_s1 = sld [smem:[#allocation8_spill]] }
 0xc8c   : > { %s30_s24 = sadd.s32 1, %s5651_s1  }
 0xc8d   : > { %p27_p5 = scmp.ge.s32.totalorder %s30_s24, 4  }
 0xc8f   :  { %29 = sbr.rel (!%p27_p5) target bundleno = 6 (0x6), region = 145 }
 0xc96   :  { %3846 = vsyncpa [#allocation3], 1 }
 0xc97   :  { %3848 = vsyncpa [#allocation3 + $0x1], 1 }
 0xc98   :  { %3849 = vsyncpa [#allocation5], 1 }

</bundles_post_ra>
